<compile_context>
chip_gen: v7x
topology: tpu7x:2x2x1
jax: 0.10.0
libtpu: 0.0.40
codegen_flags: <defaults>
</compile_context>

<pallas_src>
import functools
import math

import jax
import jax.numpy as jnp
from jax.experimental import pallas as pl
from jax.experimental.pallas import tpu as pltpu


def _round_up(x, m):
    return (x + m - 1) // m * m


# ---------------------------------------------------------------------------
# Kernel 1: recurrence.  One grid step == `ts` timesteps of
#     h_t = tanh(pre_x_t + h_{t-1} @ W_hh^T)
# (input projection + both biases already folded into pre_x via the fused
#  embedding table).  The carried hidden state lives in a grid-resident output
#  block (constant block index along the "arbitrary" time axis).
# ---------------------------------------------------------------------------
def _rnn_kernel(px_ref, whh_ref, h0_ref, hs_ref, hlast_ref, *, ts, seq_len):
    tb = pl.program_id(1)                     # time-block index (innermost axis)

    @pl.when(tb == 0)
    def _():
        hlast_ref[...] = h0_ref[...]          # (re)start carry for this batch shard

    whh = whh_ref[...]                        # (Hp, Hp) bf16, grid-invariant
    h = hlast_ref[...]                        # (BB, Hp) f32 carried state
    h_keep = h

    hs_steps = []
    # TODO(synk): for large H (>=512) switch to lax.fori_loop with partial
    # unroll to bound vreg live ranges; static unroll is fine at small H/TS.
    for i in range(ts):
        pre = px_ref[:, i, :] + jnp.dot(
            h.astype(jnp.bfloat16), whh, preferred_element_type=jnp.float32)
        h = jnp.tanh(pre)                     # (BB, Hp) f32
        hs_steps.append(h.astype(hs_ref.dtype))
        # Only real (non-padded) timesteps may advance the final hidden state.
        valid = (tb * ts + i) < seq_len
        h_keep = jnp.where(valid, h, h_keep)

    # One unmasked full-block store of all `ts` hidden states.
    hs_ref[...] = jnp.stack(hs_steps, axis=1)
    hlast_ref[...] = h_keep


# ---------------------------------------------------------------------------
# Kernel 2: batched output projection  logits = hs @ W_fc^T + b_fc
# ---------------------------------------------------------------------------
def _fc_kernel(a_ref, w_ref, b_ref, o_ref):
    o_ref[...] = (
        jnp.dot(a_ref[...], w_ref[...], preferred_element_type=jnp.float32)
        + b_ref[...]
    ).astype(o_ref.dtype)


def prepare_params(params):
    """One-time weight preprocessing (hoisted out of the per-call forward)."""
    embed_w = params["embed"]                 # (V, H)
    V, H = embed_w.shape
    Hp = _round_up(H, 128)
    Vp = _round_up(V, 128)
    pad_h = Hp - H

    # Fused gather table: table[v] = embed[v] @ W_ih^T + (b_ih + b_hh), f32.
    table = jnp.dot(embed_w.astype(jnp.bfloat16),
                    params["w_ih"].T.astype(jnp.bfloat16),
                    preferred_element_type=jnp.float32)
    table = table + (params["b_ih"] + params["b_hh"]).astype(jnp.float32)
    table_p = jnp.pad(table, ((0, 0), (0, pad_h)))                        # (V, Hp)

    whh_p = jnp.pad(params["w_hh"].T,
                    ((0, pad_h), (0, pad_h))).astype(jnp.bfloat16)        # (Hp, Hp)
    wfc_p = jnp.pad(params["w_fc"].T,
                    ((0, pad_h), (0, Vp - V))).astype(jnp.bfloat16)       # (Hp, Vp)
    bfc_p = jnp.pad(params["b_fc"], (0, Vp - V)).reshape(1, Vp).astype(jnp.float32)

    return {"table": table_p, "whh": whh_p, "wfc": wfc_p, "bfc": bfc_p}


def books_model_forward(x_tokens, h0, prep):
    """x_tokens: (B, T) int32, h0: (1, B, H) f32 -> (out (B, T, V) f32, h (1, B, H) f32)."""
    B, T = x_tokens.shape
    H = h0.shape[-1]
    V, Hp = prep["table"].shape
    Vp = prep["wfc"].shape[1]

    Bp = _round_up(max(B, 8), 8)
    if T <= 16:                               # whole sequence in one time block
        TS, Tp = T, T
    else:                                     # 16 steps per grid step
        TS, Tp = 16, _round_up(T, 16)
    num_tb = Tp // TS
    # Leading "parallel" batch axis (feeds both TensorCores on v7x).
    num_bb = 2 if (Bp % 16 == 0) else 1
    BB = Bp // num_bb

    # --- glue: fused embedding gather (x @ W_ih^T + biases already folded) ---
    # TODO(synk): the gather could move in-kernel via scalar-prefetched token
    # ids + manual DMA row gather; kept as jnp.take glue here.
    pre_x = jnp.take(prep["table"], x_tokens, axis=0)                    # (B,T,Hp) f32
    pre_x = jnp.pad(pre_x, ((0, Bp - B), (0, Tp - T), (0, 0)))           # (Bp,Tp,Hp)
    h0_p = jnp.pad(h0.reshape(B, H).astype(jnp.float32),
                   ((0, Bp - B), (0, Hp - H)))                           # (Bp,Hp)

    rnn_kernel = functools.partial(_rnn_kernel, ts=TS, seq_len=T)

    # --- kernel 1: recurrence over time -------------------------------------
    # NOTE: the grid-invariant W_hh / h0 blocks could use
    # pipeline_mode=pl.Buffered(1) to save a redundant double-buffer copy; kept
    # at the default for maximum compatibility.
    hs, h_last_p = pl.pallas_call(
        rnn_kernel,
        out_shape=(
            jax.ShapeDtypeStruct((Bp, Tp, Hp), jnp.bfloat16),   # all hidden states
            jax.ShapeDtypeStruct((Bp, Hp), jnp.float32),        # final hidden state
        ),
        grid_spec=pltpu.PrefetchScalarGridSpec(
            num_scalar_prefetch=0,
            grid=(num_bb, num_tb),
            in_specs=[
                pl.BlockSpec((BB, TS, Hp), lambda bb, tb: (bb, tb, 0)),  # pre_x chunk
                pl.BlockSpec((Hp, Hp), lambda bb, tb: (0, 0)),           # W_hh^T
                pl.BlockSpec((BB, Hp), lambda bb, tb: (bb, 0)),          # h0 shard
            ],
            out_specs=[
                pl.BlockSpec((BB, TS, Hp), lambda bb, tb: (bb, tb, 0)),  # hidden states
                pl.BlockSpec((BB, Hp), lambda bb, tb: (bb, 0)),          # resident carry
            ],
        ),
        compiler_params=pltpu.CompilerParams(
            dimension_semantics=("parallel", "arbitrary"),
            vmem_limit_bytes=48 * 1024 * 1024,
        ),
    )(pre_x, prep["whh"], h0_p)

    # --- kernel 2: fused fc projection as one batched tiled matmul ----------
    Mp = Bp * Tp
    hs2d = hs.reshape(Mp, Hp)                                            # free reshape
    TM = 256 if Mp >= 256 else Mp            # Mp is a multiple of 8
    TN = 512 if Vp >= 512 else Vp            # Vp is a multiple of 128
    Mp2 = _round_up(Mp, TM)
    Vp2 = _round_up(Vp, TN)
    if Mp2 > Mp:
        hs2d = jnp.pad(hs2d, ((0, Mp2 - Mp), (0, 0)))
    wfc_p, bfc_p = prep["wfc"], prep["bfc"]
    if Vp2 > Vp:
        wfc_p = jnp.pad(wfc_p, ((0, 0), (0, Vp2 - Vp)))
        bfc_p = jnp.pad(bfc_p, ((0, 0), (0, Vp2 - Vp)))

    logits_p = pl.pallas_call(
        _fc_kernel,
        out_shape=jax.ShapeDtypeStruct((Mp2, Vp2), jnp.float32),
        grid_spec=pltpu.PrefetchScalarGridSpec(
            num_scalar_prefetch=0,
            grid=(Mp2 // TM, Vp2 // TN),
            in_specs=[
                pl.BlockSpec((TM, Hp), lambda i, j: (i, 0)),    # hidden-state rows
                pl.BlockSpec((Hp, TN), lambda i, j: (0, j)),    # W_fc^T tile
                pl.BlockSpec((1, TN), lambda i, j: (0, j)),     # b_fc tile
            ],
            out_specs=pl.BlockSpec((TM, TN), lambda i, j: (i, j)),
        ),
        compiler_params=pltpu.CompilerParams(
            dimension_semantics=("parallel", "parallel"),
            vmem_limit_bytes=48 * 1024 * 1024,
        ),
    )(hs2d, wfc_p, bfc_p)

    out = logits_p[:Mp].reshape(Bp, Tp, Vp2)[:B, :T, :V]       # (B, T, V)
    h_last = h_last_p[:B, :H].reshape(1, B, H)
    return out, h_last


def _reference_forward(x_tokens, h0, params, *, matmul_dtype=jnp.float32):
    """Pure-JAX reference of the PyTorch forward (matmul operand dtype selectable)."""
    emb = params["embed"].astype(matmul_dtype)
    x_emb = jnp.take(emb, x_tokens, axis=0)                    # (B, T, H)
    B, T, H = x_emb.shape
    wih = params["w_ih"].T.astype(matmul_dtype)
    whh = params["w_hh"].T.astype(matmul_dtype)
    wfc = params["w_fc"].T.astype(matmul_dtype)
    b = (params["b_ih"] + params["b_hh"]).astype(jnp.float32)

    def step(h, x_t):
        pre = (jnp.dot(x_t, wih, preferred_element_type=jnp.float32)
               + jnp.dot(h.astype(matmul_dtype), whh,
                         preferred_element_type=jnp.float32)
               + b)
        h_new = jnp.tanh(pre)
        return h_new, h_new

    h_last, hs = jax.lax.scan(step, h0.reshape(B, H).astype(jnp.float32),
                              jnp.transpose(x_emb, (1, 0, 2)))
    hs = jnp.transpose(hs, (1, 0, 2))                          # (B, T, H) f32
    out = (jnp.dot(hs.astype(matmul_dtype).reshape(B * T, H), wfc,
                   preferred_element_type=jnp.float32).reshape(B, T, -1)
           + params["b_fc"].astype(jnp.float32))
    return out, h_last.reshape(1, B, H)


def _init_params(key, vocab_size, hidden_size):
    ks = jax.random.split(key, 7)
    bound = 1.0 / jnp.sqrt(hidden_size)
    return {
        "embed": jax.random.normal(ks[0], (vocab_size, hidden_size), jnp.float32),
        "w_ih": jax.random.uniform(ks[1], (hidden_size, hidden_size), jnp.float32, -bound, bound),
        "w_hh": jax.random.uniform(ks[2], (hidden_size, hidden_size), jnp.float32, -bound, bound),
        "b_ih": jax.random.uniform(ks[3], (hidden_size,), jnp.float32, -bound, bound),
        "b_hh": jax.random.uniform(ks[4], (hidden_size,), jnp.float32, -bound, bound),
        "w_fc": jax.random.uniform(ks[5], (vocab_size, hidden_size), jnp.float32, -bound, bound),
        "b_fc": jax.random.uniform(ks[6], (vocab_size,), jnp.float32, -bound, bound),
    }


if __name__ == "__main__":
    B, T, H, V = 2, 8, 32, 64
    key = jax.random.PRNGKey(0)
    k_tok, k_h, k_p = jax.random.split(key, 3)

    params = _init_params(k_p, V, H)
    x = jax.random.randint(k_tok, (B, T), 0, V, dtype=jnp.int32)
    h0 = jax.random.normal(k_h, (1, B, H), jnp.float32)

    prep = prepare_params(params)              # one-time weight preprocessing
    fwd = jax.jit(books_model_forward)
    out, h_last = jax.block_until_ready(fwd(x, h0, prep))

    assert out.shape == (B, T, V) and out.dtype == jnp.float32
    assert h_last.shape == (1, B, H)

    # Tight check against a reference using the same bf16 matmul operands.
    out_bf, h_bf = _reference_forward(x, h0, params, matmul_dtype=jnp.bfloat16)
    assert jnp.allclose(out, out_bf, atol=2e-2, rtol=2e-2)
    assert jnp.allclose(h_last, h_bf, atol=2e-2, rtol=2e-2)

    # Loose check against the pure-f32 reference (bf16 operand quantization only).
    out_f32, h_f32 = _reference_forward(x, h0, params, matmul_dtype=jnp.float32)
    assert jnp.allclose(out, out_f32, atol=1e-1, rtol=1e-1)
    assert jnp.allclose(h_last, h_f32, atol=1e-1, rtol=1e-1)

    print("KERNEL_OK")
</pallas_src>

<mosaic_0001>
module attributes {stable_mosaic.version = 11 : i64} {
  func.func @_fc_kernel(%arg0: i32, %arg1: i32, %arg2: memref<64x128xbf16, #tpu.memory_space<vmem>>, %arg3: memref<128x128xbf16, #tpu.memory_space<vmem>>, %arg4: memref<1x128xf32, #tpu.memory_space<vmem>>, %arg5: memref<64x128xf32, #tpu.memory_space<vmem>>) attributes {dimension_semantics = [#tpu.dimension_semantics<parallel>, #tpu.dimension_semantics<parallel>], iteration_bounds = array<i64: 1, 1>, scalar_prefetch = 0 : i64, scratch_operands = 0 : i64, tpu.core_type = #tpu.core_type<tc>, window_params = [{transform_indices = @transform_0, window_bounds = array<i64: 64, 128>}, {transform_indices = @transform_1, window_bounds = array<i64: 128, 128>}, {transform_indices = @transform_2, window_bounds = array<i64: 1, 128>}, {transform_indices = @transform_3, window_bounds = array<i64: 64, 128>}]} {
    %c0 = arith.constant 0 : index
    %c0_0 = arith.constant 0 : index
    %0 = vector.load %arg2[%c0, %c0_0] : memref<64x128xbf16, #tpu.memory_space<vmem>>, vector<64x128xbf16>
    %c0_1 = arith.constant 0 : index
    %c0_2 = arith.constant 0 : index
    %1 = vector.load %arg3[%c0_1, %c0_2] : memref<128x128xbf16, #tpu.memory_space<vmem>>, vector<128x128xbf16>
    %cst = arith.constant dense<0.000000e+00> : vector<64x128xf32>
    %2 = tpu.matmul %0, %1, %cst {dimension_numbers = #tpu.dot_dimension_numbers<[1], [0], [0], [1], [0, 0, 1, 1], [], []>} : vector<64x128xbf16>, vector<128x128xbf16>, vector<64x128xf32> -> vector<64x128xf32>
    %c0_3 = arith.constant 0 : index
    %c0_4 = arith.constant 0 : index
    %3 = vector.load %arg4[%c0_3, %c0_4] : memref<1x128xf32, #tpu.memory_space<vmem>>, vector<1x128xf32>
    %4 = vector.broadcast %3 : vector<1x128xf32> to vector<64x128xf32>
    %5 = arith.addf %2, %4 : vector<64x128xf32>
    %c0_5 = arith.constant 0 : index
    %c0_6 = arith.constant 0 : index
    %6 = vector.load %arg5[%c0_5, %c0_6] : memref<64x128xf32, #tpu.memory_space<vmem>>, vector<64x128xf32>
    tpu.vector_store %arg5[%c0_5, %c0_6], %5 {strides = array<i32>} : memref<64x128xf32, #tpu.memory_space<vmem>>, vector<64x128xf32>,
    return
  }
  func.func @transform_0(%arg0: i32, %arg1: i32) -> (i32, i32) {
    %c0_i32 = arith.constant 0 : i32
    %c0_i32_0 = arith.constant 0 : i32
    return %arg0, %c0_i32 : i32, i32
  }
  func.func @transform_1(%arg0: i32, %arg1: i32) -> (i32, i32) {
    %c0_i32 = arith.constant 0 : i32
    %c0_i32_0 = arith.constant 0 : i32
    return %c0_i32, %arg1 : i32, i32
  }
  func.func @transform_2(%arg0: i32, %arg1: i32) -> (i32, i32) {
    %c0_i32 = arith.constant 0 : i32
    %c0_i32_0 = arith.constant 0 : i32
    return %c0_i32, %arg1 : i32, i32
  }
  func.func @transform_3(%arg0: i32, %arg1: i32) -> (i32, i32) {
    %c0_i32 = arith.constant 0 : i32
    return %arg0, %arg1 : i32, i32
  }
}

module attributes {stable_mosaic.version = 11 : i64} {
  func.func @_rnn_kernel(%arg0: i32, %arg1: i32, %arg2: memref<8x8x128xf32, #tpu.memory_space<vmem>>, %arg3: memref<128x128xbf16, #tpu.memory_space<vmem>>, %arg4: memref<8x128xf32, #tpu.memory_space<vmem>>, %arg5: memref<8x8x128xbf16, #tpu.memory_space<vmem>>, %arg6: memref<8x128xf32, #tpu.memory_space<vmem>>) attributes {dimension_semantics = [#tpu.dimension_semantics<parallel>, #tpu.dimension_semantics<arbitrary>], iteration_bounds = array<i64: 1, 1>, scalar_prefetch = 0 : i64, scratch_operands = 0 : i64, tpu.core_type = #tpu.core_type<tc>, window_params = [{transform_indices = @transform_0, window_bounds = array<i64: 8, 8, 128>}, {pipeline_mode = #tpu.pipeline_mode<synchronous>, transform_indices = @transform_1, window_bounds = array<i64: 128, 128>}, {transform_indices = @transform_2, window_bounds = array<i64: 8, 128>}, {transform_indices = @transform_3, window_bounds = array<i64: 8, 8, 128>}, {transform_indices = @transform_4, window_bounds = array<i64: 8, 128>}]} {
    %c0_i32 = arith.constant 0 : i32
    %0 = arith.cmpi eq, %arg1, %c0_i32 : i32
    %1 = arith.extui %0 : i1 to i32
    %c0_i32_0 = arith.constant 0 : i32
    %2 = arith.cmpi ne, %1, %c0_i32_0 : i32
    scf.if %2 {
      %c0_49 = arith.constant 0 : index
      %c0_50 = arith.constant 0 : index
      %104 = vector.load %arg4[%c0_49, %c0_50] : memref<8x128xf32, #tpu.memory_space<vmem>>, vector<8x128xf32>
      %c0_51 = arith.constant 0 : index
      %c0_52 = arith.constant 0 : index
      %105 = vector.load %arg6[%c0_51, %c0_52] : memref<8x128xf32, #tpu.memory_space<vmem>>, vector<8x128xf32>
      tpu.vector_store %arg6[%c0_51, %c0_52], %104 {strides = array<i32>} : memref<8x128xf32, #tpu.memory_space<vmem>>, vector<8x128xf32>,
    } else {
    }
    %c0 = arith.constant 0 : index
    %c0_1 = arith.constant 0 : index
    %3 = vector.load %arg3[%c0, %c0_1] : memref<128x128xbf16, #tpu.memory_space<vmem>>, vector<128x128xbf16>
    %c0_2 = arith.constant 0 : index
    %c0_3 = arith.constant 0 : index
    %4 = vector.load %arg6[%c0_2, %c0_3] : memref<8x128xf32, #tpu.memory_space<vmem>>, vector<8x128xf32>
    %c0_4 = arith.constant 0 : index
    %c0_5 = arith.constant 0 : index
    %c0_6 = arith.constant 0 : index
    %5 = vector.load %arg2[%c0_4, %c0_5, %c0_6] : memref<8x8x128xf32, #tpu.memory_space<vmem>>, vector<8x1x128xf32>
    %6 = vector.shape_cast %5 : vector<8x1x128xf32> to vector<8x128xf32>
    %7 = arith.truncf %4 : vector<8x128xf32> to vector<8x128xbf16>
    %cst = arith.constant dense<0.000000e+00> : vector<8x128xf32>
    %8 = tpu.matmul %7, %3, %cst {dimension_numbers = #tpu.dot_dimension_numbers<[1], [0], [0], [1], [0, 0, 1, 1], [], []>} : vector<8x128xbf16>, vector<128x128xbf16>, vector<8x128xf32> -> vector<8x128xf32>
    %9 = arith.addf %6, %8 : vector<8x128xf32>
    %10 = math.tanh %9 : vector<8x128xf32>
    %11 = arith.truncf %10 : vector<8x128xf32> to vector<8x128xbf16>
    %c8_i32 = arith.constant 8 : i32
    %12 = arith.muli %arg1, %c8_i32 : i32
    %c0_i32_7 = arith.constant 0 : i32
    %13 = arith.addi %12, %c0_i32_7 : i32
    %c8_i32_8 = arith.constant 8 : i32
    %14 = arith.cmpi slt, %13, %c8_i32_8 : i32
    %15 = arith.select %14, %10, %4 : vector<8x128xf32>
    %c0_9 = arith.constant 0 : index
    %c1 = arith.constant 1 : index
    %c0_10 = arith.constant 0 : index
    %16 = vector.load %arg2[%c0_9, %c1, %c0_10] : memref<8x8x128xf32, #tpu.memory_space<vmem>>, vector<8x1x128xf32>
    %17 = vector.shape_cast %16 : vector<8x1x128xf32> to vector<8x128xf32>
    %18 = arith.truncf %10 : vector<8x128xf32> to vector<8x128xbf16>
    %cst_11 = arith.constant dense<0.000000e+00> : vector<8x128xf32>
    %19 = tpu.matmul %18, %3, %cst_11 {dimension_numbers = #tpu.dot_dimension_numbers<[1], [0], [0], [1], [0, 0, 1, 1], [], []>} : vector<8x128xbf16>, vector<128x128xbf16>, vector<8x128xf32> -> vector<8x128xf32>
    %20 = arith.addf %17, %19 : vector<8x128xf32>
    %21 = math.tanh %20 : vector<8x128xf32>
    %22 = arith.truncf %21 : vector<8x128xf32> to vector<8x128xbf16>
    %c8_i32_12 = arith.constant 8 : i32
    %23 = arith.muli %arg1, %c8_i32_12 : i32
    %c1_i32 = arith.constant 1 : i32
    %24 = arith.addi %23, %c1_i32 : i32
    %c8_i32_13 = arith.constant 8 : i32
    %25 = arith.cmpi slt, %24, %c8_i32_13 : i32
    %26 = arith.select %25, %21, %15 : vector<8x128xf32>
    %c0_14 = arith.constant 0 : index
    %c2 = arith.constant 2 : index
    %c0_15 = arith.constant 0 : index
    %27 = vector.load %arg2[%c0_14, %c2, %c0_15] : memref<8x8x128xf32, #tpu.memory_space<vmem>>, vector<8x1x128xf32>
    %28 = vector.shape_cast %27 : vector<8x1x128xf32> to vector<8x128xf32>
    %29 = arith.truncf %21 : vector<8x128xf32> to vector<8x128xbf16>
    %cst_16 = arith.constant dense<0.000000e+00> : vector<8x128xf32>
    %30 = tpu.matmul %29, %3, %cst_16 {dimension_numbers = #tpu.dot_dimension_numbers<[1], [0], [0], [1], [0, 0, 1, 1], [], []>} : vector<8x128xbf16>, vector<128x128xbf16>, vector<8x128xf32> -> vector<8x128xf32>
    %31 = arith.addf %28, %30 : vector<8x128xf32>
    %32 = math.tanh %31 : vector<8x128xf32>
    %33 = arith.truncf %32 : vector<8x128xf32> to vector<8x128xbf16>
    %c8_i32_17 = arith.constant 8 : i32
    %34 = arith.muli %arg1, %c8_i32_17 : i32
    %c2_i32 = arith.constant 2 : i32
    %35 = arith.addi %34, %c2_i32 : i32
    %c8_i32_18 = arith.constant 8 : i32
    %36 = arith.cmpi slt, %35, %c8_i32_18 : i32
    %37 = arith.select %36, %32, %26 : vector<8x128xf32>
    %c0_19 = arith.constant 0 : index
    %c3 = arith.constant 3 : index
    %c0_20 = arith.constant 0 : index
    %38 = vector.load %arg2[%c0_19, %c3, %c0_20] : memref<8x8x128xf32, #tpu.memory_space<vmem>>, vector<8x1x128xf32>
    %39 = vector.shape_cast %38 : vector<8x1x128xf32> to vector<8x128xf32>
    %40 = arith.truncf %32 : vector<8x128xf32> to vector<8x128xbf16>
    %cst_21 = arith.constant dense<0.000000e+00> : vector<8x128xf32>
    %41 = tpu.matmul %40, %3, %cst_21 {dimension_numbers = #tpu.dot_dimension_numbers<[1], [0], [0], [1], [0, 0, 1, 1], [], []>} : vector<8x128xbf16>, vector<128x128xbf16>, vector<8x128xf32> -> vector<8x128xf32>
    %42 = arith.addf %39, %41 : vector<8x128xf32>
    %43 = math.tanh %42 : vector<8x128xf32>
    %44 = arith.truncf %43 : vector<8x128xf32> to vector<8x128xbf16>
    %c8_i32_22 = arith.constant 8 : i32
    %45 = arith.muli %arg1, %c8_i32_22 : i32
    %c3_i32 = arith.constant 3 : i32
    %46 = arith.addi %45, %c3_i32 : i32
    %c8_i32_23 = arith.constant 8 : i32
    %47 = arith.cmpi slt, %46, %c8_i32_23 : i32
    %48 = arith.select %47, %43, %37 : vector<8x128xf32>
    %c0_24 = arith.constant 0 : index
    %c4 = arith.constant 4 : index
    %c0_25 = arith.constant 0 : index
    %49 = vector.load %arg2[%c0_24, %c4, %c0_25] : memref<8x8x128xf32, #tpu.memory_space<vmem>>, vector<8x1x128xf32>
    %50 = vector.shape_cast %49 : vector<8x1x128xf32> to vector<8x128xf32>
    %51 = arith.truncf %43 : vector<8x128xf32> to vector<8x128xbf16>
    %cst_26 = arith.constant dense<0.000000e+00> : vector<8x128xf32>
    %52 = tpu.matmul %51, %3, %cst_26 {dimension_numbers = #tpu.dot_dimension_numbers<[1], [0], [0], [1], [0, 0, 1, 1], [], []>} : vector<8x128xbf16>, vector<128x128xbf16>, vector<8x128xf32> -> vector<8x128xf32>
    %53 = arith.addf %50, %52 : vector<8x128xf32>
    %54 = math.tanh %53 : vector<8x128xf32>
    %55 = arith.truncf %54 : vector<8x128xf32> to vector<8x128xbf16>
    %c8_i32_27 = arith.constant 8 : i32
    %56 = arith.muli %arg1, %c8_i32_27 : i32
    %c4_i32 = arith.constant 4 : i32
    %57 = arith.addi %56, %c4_i32 : i32
    %c8_i32_28 = arith.constant 8 : i32
    %58 = arith.cmpi slt, %57, %c8_i32_28 : i32
    %59 = arith.select %58, %54, %48 : vector<8x128xf32>
    %c0_29 = arith.constant 0 : index
    %c5 = arith.constant 5 : index
    %c0_30 = arith.constant 0 : index
    %60 = vector.load %arg2[%c0_29, %c5, %c0_30] : memref<8x8x128xf32, #tpu.memory_space<vmem>>, vector<8x1x128xf32>
    %61 = vector.shape_cast %60 : vector<8x1x128xf32> to vector<8x128xf32>
    %62 = arith.truncf %54 : vector<8x128xf32> to vector<8x128xbf16>
    %cst_31 = arith.constant dense<0.000000e+00> : vector<8x128xf32>
    %63 = tpu.matmul %62, %3, %cst_31 {dimension_numbers = #tpu.dot_dimension_numbers<[1], [0], [0], [1], [0, 0, 1, 1], [], []>} : vector<8x128xbf16>, vector<128x128xbf16>, vector<8x128xf32> -> vector<8x128xf32>
    %64 = arith.addf %61, %63 : vector<8x128xf32>
    %65 = math.tanh %64 : vector<8x128xf32>
    %66 = arith.truncf %65 : vector<8x128xf32> to vector<8x128xbf16>
    %c8_i32_32 = arith.constant 8 : i32
    %67 = arith.muli %arg1, %c8_i32_32 : i32
    %c5_i32 = arith.constant 5 : i32
    %68 = arith.addi %67, %c5_i32 : i32
    %c8_i32_33 = arith.constant 8 : i32
    %69 = arith.cmpi slt, %68, %c8_i32_33 : i32
    %70 = arith.select %69, %65, %59 : vector<8x128xf32>
    %c0_34 = arith.constant 0 : index
    %c6 = arith.constant 6 : index
    %c0_35 = arith.constant 0 : index
    %71 = vector.load %arg2[%c0_34, %c6, %c0_35] : memref<8x8x128xf32, #tpu.memory_space<vmem>>, vector<8x1x128xf32>
    %72 = vector.shape_cast %71 : vector<8x1x128xf32> to vector<8x128xf32>
    %73 = arith.truncf %65 : vector<8x128xf32> to vector<8x128xbf16>
    %cst_36 = arith.constant dense<0.000000e+00> : vector<8x128xf32>
    %74 = tpu.matmul %73, %3, %cst_36 {dimension_numbers = #tpu.dot_dimension_numbers<[1], [0], [0], [1], [0, 0, 1, 1], [], []>} : vector<8x128xbf16>, vector<128x128xbf16>, vector<8x128xf32> -> vector<8x128xf32>
    %75 = arith.addf %72, %74 : vector<8x128xf32>
    %76 = math.tanh %75 : vector<8x128xf32>
    %77 = arith.truncf %76 : vector<8x128xf32> to vector<8x128xbf16>
    %c8_i32_37 = arith.constant 8 : i32
    %78 = arith.muli %arg1, %c8_i32_37 : i32
    %c6_i32 = arith.constant 6 : i32
    %79 = arith.addi %78, %c6_i32 : i32
    %c8_i32_38 = arith.constant 8 : i32
    %80 = arith.cmpi slt, %79, %c8_i32_38 : i32
    %81 = arith.select %80, %76, %70 : vector<8x128xf32>
    %c0_39 = arith.constant 0 : index
    %c7 = arith.constant 7 : index
    %c0_40 = arith.constant 0 : index
    %82 = vector.load %arg2[%c0_39, %c7, %c0_40] : memref<8x8x128xf32, #tpu.memory_space<vmem>>, vector<8x1x128xf32>
    %83 = vector.shape_cast %82 : vector<8x1x128xf32> to vector<8x128xf32>
    %84 = arith.truncf %76 : vector<8x128xf32> to vector<8x128xbf16>
    %cst_41 = arith.constant dense<0.000000e+00> : vector<8x128xf32>
    %85 = tpu.matmul %84, %3, %cst_41 {dimension_numbers = #tpu.dot_dimension_numbers<[1], [0], [0], [1], [0, 0, 1, 1], [], []>} : vector<8x128xbf16>, vector<128x128xbf16>, vector<8x128xf32> -> vector<8x128xf32>
    %86 = arith.addf %83, %85 : vector<8x128xf32>
    %87 = math.tanh %86 : vector<8x128xf32>
    %88 = arith.truncf %87 : vector<8x128xf32> to vector<8x128xbf16>
    %c8_i32_42 = arith.constant 8 : i32
    %89 = arith.muli %arg1, %c8_i32_42 : i32
    %c7_i32 = arith.constant 7 : i32
    %90 = arith.addi %89, %c7_i32 : i32
    %c8_i32_43 = arith.constant 8 : i32
    %91 = arith.cmpi slt, %90, %c8_i32_43 : i32
    %92 = arith.select %91, %87, %81 : vector<8x128xf32>
    %93 = vector.shape_cast %11 : vector<8x128xbf16> to vector<8x1x128xbf16>
    %94 = vector.shape_cast %22 : vector<8x128xbf16> to vector<8x1x128xbf16>
    %95 = vector.shape_cast %33 : vector<8x128xbf16> to vector<8x1x128xbf16>
    %96 = vector.shape_cast %44 : vector<8x128xbf16> to vector<8x1x128xbf16>
    %97 = vector.shape_cast %55 : vector<8x128xbf16> to vector<8x1x128xbf16>
    %98 = vector.shape_cast %66 : vector<8x128xbf16> to vector<8x1x128xbf16>
    %99 = vector.shape_cast %77 : vector<8x128xbf16> to vector<8x1x128xbf16>
    %100 = vector.shape_cast %88 : vector<8x128xbf16> to vector<8x1x128xbf16>
    %101 = tpu.concatenate %93, %94, %95, %96, %97, %98, %99, %100 in 1 : vector<8x1x128xbf16>, vector<8x1x128xbf16>, vector<8x1x128xbf16>, vector<8x1x128xbf16>, vector<8x1x128xbf16>, vector<8x1x128xbf16>, vector<8x1x128xbf16>, vector<8x1x128xbf16> -> vector<8x8x128xbf16>
    %c0_44 = arith.constant 0 : index
    %c0_45 = arith.constant 0 : index
    %c0_46 = arith.constant 0 : index
    %102 = vector.load %arg5[%c0_44, %c0_45, %c0_46] : memref<8x8x128xbf16, #tpu.memory_space<vmem>>, vector<8x8x128xbf16>
    tpu.vector_store %arg5[%c0_44, %c0_45, %c0_46], %101 {strides = array<i32>} : memref<8x8x128xbf16, #tpu.memory_space<vmem>>, vector<8x8x128xbf16>,
    %c0_47 = arith.constant 0 : index
    %c0_48 = arith.constant 0 : index
    %103 = vector.load %arg6[%c0_47, %c0_48] : memref<8x128xf32, #tpu.memory_space<vmem>>, vector<8x128xf32>
    tpu.vector_store %arg6[%c0_47, %c0_48], %92 {strides = array<i32>} : memref<8x128xf32, #tpu.memory_space<vmem>>, vector<8x128xf32>,
    return
  }
  func.func @transform_0(%arg0: i32, %arg1: i32) -> (i32, i32, i32) {
    %c0_i32 = arith.constant 0 : i32
    %c0_i32_0 = arith.constant 0 : i32
    return %arg0, %arg1, %c0_i32 : i32, i32, i32
  }
  func.func @transform_1(%arg0: i32, %arg1: i32) -> (i32, i32) {
    %c0_i32 = arith.constant 0 : i32
    %c0_i32_0 = arith.constant 0 : i32
    %c0_i32_1 = arith.constant 0 : i32
    return %c0_i32, %c0_i32_0 : i32, i32
  }
  func.func @transform_2(%arg0: i32, %arg1: i32) -> (i32, i32) {
    %c0_i32 = arith.constant 0 : i32
    %c0_i32_0 = arith.constant 0 : i32
    return %arg0, %c0_i32 : i32, i32
  }
  func.func @transform_3(%arg0: i32, %arg1: i32) -> (i32, i32, i32) {
    %c0_i32 = arith.constant 0 : i32
    %c0_i32_0 = arith.constant 0 : i32
    return %arg0, %arg1, %c0_i32 : i32, i32, i32
  }
  func.func @transform_4(%arg0: i32, %arg1: i32) -> (i32, i32) {
    %c0_i32 = arith.constant 0 : i32
    %c0_i32_0 = arith.constant 0 : i32
    return %arg0, %c0_i32 : i32, i32
  }
}

</mosaic_0001>

<bundles_post_ra>
// kernel: books_model_forward.3
= control target key start
LH: loop header
LB: loop body
LE: loop exit
PB: predicated region body
PF: predicated region fallthrough
CT: control target
= control target key end

     0   :  { %s355_s1 = inlined_call_operand.vmem [shape: bf16[128,128], index: 1, kind: input, shape index: {}]   ;;  %s356_s0 = inlined_call_operand.vmem [shape: bf16[64,128], index: 0, kind: input, shape index: {}]   ;;  %s357_s2 = inlined_call_operand.vmem [shape: f32[1,128], index: 2, kind: input, shape index: {}]   ;;  %s358_s3 = inlined_call_operand.vmem [shape: f32[64,128], index: 3, kind: output, shape index: {}]  }
   0x1   :  { %v260_v0 = vld [vmem:[%s355_s1] sm:$0xff]   ;;  %v261_v1 = vld [vmem:[%s355_s1 + $0x8] sm:$0xff]   ;;  %v262_v2 = vld [vmem:[%s355_s1 + $0x10] sm:$0xff]  }
   0x2   :  { %220 = vmatprep.subr.bf16.mxu0 %v260_v0  ;;  %244 = vmatprep.subr.bf16.mxu1 %v260_v0  ;;  %v263_v3 = vld [vmem:[%s355_s1 + $0x18] sm:$0xff]   ;;  %v268_v4 = vld [vmem:[%s356_s0] sm:$0xff]   ;;  %v269_v5 = vld [vmem:[%s356_s0 + $0x10] sm:$0xff]  }
   0x3   :  { %221 = vmatpush3.bf16.msra.mxu0 %v260_v0  ;;  %252 = vmatpush3.bf16.msra.mxu1 %v260_v0  ;;  %v264_v6 = vld [vmem:[%s355_s1 + $0x20] sm:$0xff]   ;;  %v265_v7 = vld [vmem:[%s355_s1 + $0x28] sm:$0xff]   ;;  %v266_v8 = vld [vmem:[%s355_s1 + $0x30] sm:$0xff]  }
   0x4   :  { %222 = vmatprep.subr.bf16.mxu0 %v261_v1  ;;  %245 = vmatprep.subr.bf16.mxu1 %v261_v1  ;;  %v267_v9 = vld [vmem:[%s355_s1 + $0x38] sm:$0xff]   ;;  %v270_v10 = vld [vmem:[%s356_s0 + $0x8] sm:$0xff]   ;;  %v195_v12 = vld [vmem:[%s357_s2] ss:$0 sm:$0xff] }
   0x5   :  { %236 = vmatprep.mubr.bf16.mxu0 %v268_v4  ;;  %240 = vmatprep.mubr.bf16.mxu1 %v269_v5  ;;  %v271_v11 = vld [vmem:[%s356_s0 + $0x18] sm:$0xff]  }
   0x7   :  { %223 = vmatpush3.bf16.msra.mxu0 %v261_v1  ;;  %253 = vmatpush3.bf16.msra.mxu1 %v261_v1 }
   0x8   :  { %224 = vmatprep.subr.bf16.mxu0 %v262_v2  ;;  %246 = vmatprep.subr.bf16.mxu1 %v262_v2 }
   0xb   :  { %225 = vmatpush3.bf16.msra.mxu0 %v262_v2  ;;  %254 = vmatpush3.bf16.msra.mxu1 %v262_v2 }
   0xc   :  { %226 = vmatprep.subr.bf16.mxu0 %v263_v3  ;;  %247 = vmatprep.subr.bf16.mxu1 %v263_v3 }
   0xf   :  { %227 = vmatpush3.bf16.msra.mxu0 %v263_v3  ;;  %255 = vmatpush3.bf16.msra.mxu1 %v263_v3 }
  0x10   :  { %228 = vmatprep.subr.bf16.mxu0 %v264_v6  ;;  %248 = vmatprep.subr.bf16.mxu1 %v264_v6 }
  0x13   :  { %229 = vmatpush3.bf16.msra.mxu0 %v264_v6  ;;  %256 = vmatpush3.bf16.msra.mxu1 %v264_v6 }
  0x14   :  { %230 = vmatprep.subr.bf16.mxu0 %v265_v7  ;;  %249 = vmatprep.subr.bf16.mxu1 %v265_v7 }
  0x17   :  { %231 = vmatpush3.bf16.msra.mxu0 %v265_v7  ;;  %257 = vmatpush3.bf16.msra.mxu1 %v265_v7 }
  0x18   :  { %232 = vmatprep.subr.bf16.mxu0 %v266_v8  ;;  %250 = vmatprep.subr.bf16.mxu1 %v266_v8 }
  0x1b   :  { %233 = vmatpush3.bf16.msra.mxu0 %v266_v8  ;;  %258 = vmatpush3.bf16.msra.mxu1 %v266_v8 }
  0x1c   :  { %234 = vmatprep.subr.bf16.mxu0 %v267_v9  ;;  %251 = vmatprep.subr.bf16.mxu1 %v267_v9 }
  0x1f   :  { %235 = vmatpush3.bf16.msra.mxu0 %v267_v9  ;;  %259 = vmatpush3.bf16.msra.mxu1 %v267_v9 }
  0x22   :  { %237 = vmatmul.mubr.bf16.vlgmr.msra.gmra.mrb[0].mxu0 %v270_v10  ;;  %241 = vmatmul.mubr.bf16.vlgmr.msra.gmra.mrb[0].mxu1 %v271_v11 }
  0xf5   :  { %v238_v13 = vpop.f32.mrb[0].mxu0  ;;  %v242_v14 = vpop.f32.mrb[0].mxu1 }
  0xf6   :  { %v161_v15 = vadd.f32 %v238_v13, %v195_v12  ;;  %v177_v16 = vadd.f32 %v242_v14, %v195_v12  ;;  %v152_v17 = vpop.f32.mrb[1].mxu0  ;;  %v168_v18 = vpop.f32.mrb[1].mxu1 }
  0xf7   :  { %v153_v19 = vadd.f32 %v195_v12, %v152_v17  ;;  %v169_v20 = vadd.f32 %v195_v12, %v168_v18  ;;  %v239_v21 = vpop.f32.mrb[2].mxu0  ;;  %v243_v22 = vpop.f32.mrb[2].mxu1 }
  0xf8   :  { %185 = vst [vmem:[%s358_s3 + $0x10] sm:$0xff] %v161_v15  ;;  %189 = vst [vmem:[%s358_s3 + $0x30] sm:$0xff] %v177_v16  ;;  %v164_v23 = vadd.f32 %v239_v21, %v195_v12  ;;  %v180_v24 = vadd.f32 %v243_v22, %v195_v12  ;;  %v155_v25 = vpop.f32.mrb[3].mxu0  ;;  %v171_v26 = vpop.f32.mrb[3].mxu1 }
  0xf9   :  { %183 = vst [vmem:[%s358_s3] sm:$0xff] %v153_v19  ;;  %187 = vst [vmem:[%s358_s3 + $0x20] sm:$0xff] %v169_v20  ;;  %v156_v27 = vadd.f32 %v195_v12, %v155_v25  ;;  %v172_v28 = vadd.f32 %v195_v12, %v171_v26 }
  0xfa   :  { %186 = vst [vmem:[%s358_s3 + $0x18] sm:$0xff] %v164_v23  ;;  %190 = vst [vmem:[%s358_s3 + $0x38] sm:$0xff] %v180_v24 }
  0xfb   :  { %184 = vst [vmem:[%s358_s3 + $0x8] sm:$0xff] %v156_v27  ;;  %188 = vst [vmem:[%s358_s3 + $0x28] sm:$0xff] %v172_v28 }

// kernel: books_model_forward.2
= control target key start
LH: loop header
LB: loop body
LE: loop exit
PB: predicated region body
PF: predicated region fallthrough
CT: control target
= control target key end

     0   :  { %v1889_v0 = vmov 0.0   ;;  %vm1890_vm0 = vmmov 0   ;;  %vm231_vm1 = vcmask 1041409   ;;  %vm234_vm2 = vcmask 1042434   ;;  %s2765_s1 = inlined_call_operand.vmem [shape: bf16[128,128], index: 1, kind: input, shape index: {}]   ;;  %s2766_s2 = inlined_call_operand.vmem [shape: f32[8,128], index: 2, kind: input, shape index: {}]   ;;  %s2767_s0 = inlined_call_operand.vmem [shape: f32[8,8,128], index: 0, kind: input, shape index: {}]   ;;  %s2768_s3 = inlined_call_operand.vmem [shape: bf16[8,8,128], index: 3, kind: output, shape index: {0}]   ;;  %s2769_s4 = inlined_call_operand.vmem [shape: f32[8,128], index: 4, kind: output, shape index: {1}]  }
   0x1   :  { %1583 = vmatprep.subr.bf16.mxu0 %v1889_v0  ;;  %v1920_v1 = vld [vmem:[%s2765_s1] sm:$0xff]   ;;  %1599 = vmatprep.mubr.msk.bf16.mxu0 %vm1890_vm0, %v1889_v0  ;;  %v1931_v2 = vld [vmem:[%s2765_s1 + $0x8] sm:$0xff]   ;;  %v1940_v3 = vld [vmem:[%s2765_s1 + $0x10] sm:$0xff]   ;;  %vm237_vm3 = vcmask 1043459   ;;  %vm240_vm4 = vcmask 1044484   ;;  %vm243_vm5 = vcmask 1045509  }
   0x2   :  { %1603 = vmatprep.subr.bf16.mxu1 %v1889_v0  ;;  %1619 = vmatprep.mubr.msk.bf16.mxu1 %vm1890_vm0, %v1889_v0  ;;  %v1949_v4 = vld [vmem:[%s2765_s1 + $0x18] sm:$0xff]   ;;  %v1958_v5 = vld [vmem:[%s2765_s1 + $0x20] sm:$0xff]   ;;  %v1967_v6 = vld [vmem:[%s2765_s1 + $0x28] sm:$0xff]   ;;  %vm246_vm6 = vcmask 1046534   ;;  %vm249_vm7 = vcmask 1047559   ;;  %vm1320_vm8 = vcmask 1040384  }
   0x3   :  { %1584 = vmatpush3.bf16.msra.mxu0 %v1920_v1  ;;  %1604 = vmatpush3.bf16.msra.mxu1 %v1920_v1  ;;  %v1976_v7 = vld [vmem:[%s2765_s1 + $0x30] sm:$0xff]   ;;  %v1985_v8 = vld [vmem:[%s2765_s1 + $0x38] sm:$0xff]   ;;  %v21_v9 = vld [vmem:[%s2766_s2] sm:$0xff]  ;;  %vm1321_vm9 = vsmask.f32 256  ;;  %vm1364_vm11 = vcmask 1041408  }
   0x4   :  { %1585 = vmatprep.subr.bf16.mxu0 %v1889_v0  ;;  %1605 = vmatprep.subr.bf16.mxu1 %v1889_v0  ;;  %v48_v10 = vpack.c.bf16 %v21_v9, %v21_v9  ;;  %v40_v11 = vld [vmem:[%s2767_s0] sm:$0x1]  ;;  %v41_v12 = vld [vmem:[%s2767_s0 + $0x8] sm:$0x1]  ;;  %v42_v13 = vld [vmem:[%s2767_s0 + $0x10] sm:$0x1] }
   0x5   :  { %v43_v14 = vld [vmem:[%s2767_s0 + $0x18] sm:$0x1]  ;;  %v44_v16 = vld [vmem:[%s2767_s0 + $0x20] sm:$0x1]  ;;  %v45_v25 = vld [vmem:[%s2767_s0 + $0x28] sm:$0x1] }
   0x6   :  { %v46_v31 = vld [vmem:[%s2767_s0 + $0x30] sm:$0x1]  ;;  %v47_v33 = vld [vmem:[%s2767_s0 + $0x38] sm:$0x1]  ;;  %vm2189_vm10 = vmand %vm1320_vm8, %vm1321_vm9  ;;  %vm1365_vm12 = vsmask.f32 1280 }
   0x7   :  { %1586 = vmatpush3.bf16.msra.mxu0 %v1931_v2  ;;  %1606 = vmatpush3.bf16.msra.mxu1 %v1931_v2  ;;  %vm2296_vm13 = vmand %vm1364_vm11, %vm1365_vm12  ;;  %vm1408_vm14 = vcmask 1042432   ;;  %vm1409_vm15 = vsmask.f32 2304  ;;  %vm1453_vm9 = vsmask.f32 3328 }
   0x8   :  { %1587 = vmatprep.subr.bf16.mxu0 %v1889_v0  ;;  %1607 = vmatprep.subr.bf16.mxu1 %v1889_v0 }
   0xb   :  { %1588 = vmatpush3.bf16.msra.mxu0 %v1940_v3  ;;  %1608 = vmatpush3.bf16.msra.mxu1 %v1940_v3 }
   0xc   :  { %1589 = vmatprep.subr.bf16.mxu0 %v1889_v0  ;;  %1609 = vmatprep.subr.bf16.mxu1 %v1889_v0 }
   0xf   :  { %1590 = vmatpush3.bf16.msra.mxu0 %v1949_v4  ;;  %1610 = vmatpush3.bf16.msra.mxu1 %v1949_v4 }
  0x10   :  { %1591 = vmatprep.subr.bf16.mxu0 %v1889_v0  ;;  %1611 = vmatprep.subr.bf16.mxu1 %v1889_v0 }
  0x13   :  { %1592 = vmatpush3.bf16.msra.mxu0 %v1958_v5  ;;  %1612 = vmatpush3.bf16.msra.mxu1 %v1958_v5 }
  0x14   :  { %1593 = vmatprep.subr.bf16.mxu0 %v1889_v0  ;;  %1613 = vmatprep.subr.bf16.mxu1 %v1889_v0 }
  0x17   :  { %1594 = vmatpush3.bf16.msra.mxu0 %v1967_v6  ;;  %1614 = vmatpush3.bf16.msra.mxu1 %v1967_v6 }
  0x18   :  { %1595 = vmatprep.subr.bf16.mxu0 %v1889_v0  ;;  %1615 = vmatprep.subr.bf16.mxu1 %v1889_v0 }
  0x1b   :  { %1596 = vmatpush3.bf16.msra.mxu0 %v1976_v7  ;;  %1616 = vmatpush3.bf16.msra.mxu1 %v1976_v7 }
  0x1c   :  { %1597 = vmatprep.subr.bf16.mxu0 %v1889_v0  ;;  %1617 = vmatprep.subr.bf16.mxu1 %v1889_v0 }
  0x1f   :  { %1598 = vmatpush3.bf16.msra.mxu0 %v1985_v8  ;;  %1618 = vmatpush3.bf16.msra.mxu1 %v1985_v8 }
  0x20   :  { %1623 = vmatprep.subr.bf16.mxu0 %v1889_v0  ;;  %1643 = vmatprep.subr.bf16.mxu1 %v1889_v0 }
  0x22   :  { %1600 = vmatmul.mubr.bf16.vlgmr.msra.gmra.mrb[0].mxu0 %v48_v10 }
  0x23   :  { %1624 = vmatpush3.bf16.msra.mxu0 %v1920_v1  ;;  %1639 = vmatprep.mubr.msk.bf16.mxu0 %vm1890_vm0, %v1889_v0 }
  0x24   :  { %1625 = vmatprep.subr.bf16.mxu0 %v1889_v0 }
  0x27   :  { %1626 = vmatpush3.bf16.msra.mxu0 %v1931_v2 }
  0x28   :  { %1627 = vmatprep.subr.bf16.mxu0 %v1889_v0 }
  0x2b   :  { %1628 = vmatpush3.bf16.msra.mxu0 %v1940_v3 }
  0x2c   :  { %1629 = vmatprep.subr.bf16.mxu0 %v1889_v0 }
  0x2f   :  { %1630 = vmatpush3.bf16.msra.mxu0 %v1949_v4 }
  0x30   :  { %1631 = vmatprep.subr.bf16.mxu0 %v1889_v0 }
  0x33   :  { %1632 = vmatpush3.bf16.msra.mxu0 %v1958_v5 }
  0x34   :  { %1633 = vmatprep.subr.bf16.mxu0 %v1889_v0 }
  0x37   :  { %1634 = vmatpush3.bf16.msra.mxu0 %v1967_v6 }
  0x38   :  { %1635 = vmatprep.subr.bf16.mxu0 %v1889_v0 }
  0x3b   :  { %1636 = vmatpush3.bf16.msra.mxu0 %v1976_v7 }
  0x3c   :  { %1637 = vmatprep.subr.bf16.mxu0 %v1889_v0 }
  0x3f   :  { %1638 = vmatpush3.bf16.msra.mxu0 %v1985_v8 }
  0x40   :  { %1663 = vmatprep.subr.bf16.mxu0 %v1889_v0 }
  0xf5   :  { %v131_v15 = vpop.f32.mrb[0].mxu0 }
  0xf6   :  { %v138_v17 = vrot.slane %v131_v15, 1  ;;  %v139_v18 = vrot.slane %v131_v15, 2  ;;  %v140_v19 = vrot.slane %v131_v15, 3  ;;  %v141_v20 = vrot.slane %v131_v15, 4  ;;  %v1601_v21 = vpop.f32.mrb[1].mxu0 }
  0xf7   :  { %v142_v22 = vrot.slane %v131_v15, 5  ;;  %v153_v23 = vadd.f32 %v131_v15, %v40_v11  ;;  %v134_v24 = vpop.f32.mrb[2].mxu0  ;;  %v143_v26 = vrot.slane %v131_v15, 6  ;;  %v144_v32 = vrot.slane %v131_v15, 7 }
  0xf8   :  { %v154_v27 = vadd.f32 %v138_v17, %v41_v12  ;;  %v155_v28 = vadd.f32 %v139_v18, %v42_v13  ;;  %v156_v29 = vadd.f32 %v140_v19, %v43_v14  ;;  %v1602_v30 = vpop.f32.mrb[3].mxu0  ;;  %v157_v34 = vadd.f32 %v141_v20, %v44_v16  ;;  %v208_v24 = vld [vmem:[%s2767_s0 + $0x11] sm:$0x1] }
  0xf9   :  { %1753 = vtanh.f32 %v153_v23  ;;  %v158_v35 = vadd.f32 %v142_v22, %v45_v25  ;;  %v159_v36 = vadd.f32 %v143_v26, %v46_v31  ;;  %v160_v37 = vadd.f32 %v144_v32, %v47_v33  ;;  %v206_v22 = vld [vmem:[%s2767_s0 + $0x1] sm:$0x1]  ;;  %v207_v23 = vld [vmem:[%s2767_s0 + $0x9] sm:$0x1]  ;;  %v209_v25 = vld [vmem:[%s2767_s0 + $0x19] sm:$0x1] }
  0xfa   :  { %1755 = vtanh.f32 %v154_v27  ;;  %v210_v26 = vld [vmem:[%s2767_s0 + $0x21] sm:$0x1]  ;;  %v211_v33 = vld [vmem:[%s2767_s0 + $0x29] sm:$0x1] }
  0xfb   :  { %1757 = vtanh.f32 %v155_v28 }
  0xfc   :  { %1759 = vtanh.f32 %v156_v29 }
  0xfd   :  { %1761 = vtanh.f32 %v157_v34 }
  0xfe   :  { %1763 = vtanh.f32 %v158_v35 }
  0xff   :  { %1765 = vtanh.f32 %v159_v36 }
 0x100   :  { %1767 = vtanh.f32 %v160_v37 }
 0x103   :  { %v1754_v38 = vpop.eup %1753 }
 0x104   :  { %v1756_v39 = vpop.eup %1755  ;;  %v2039_v41 = vpack.c.bf16 %v1754_v38, %v1754_v38 }
 0x105   :  { %v1758_v40 = vpop.eup %1757  ;;  %v2041_v42 = vpack.c.bf16 %v1756_v39, %v1756_v39 }
 0x106   :  { %v1760_v43 = vpop.eup %1759  ;;  %v2043_v44 = vpack.c.bf16 %v1758_v40, %v1758_v40  ;;  %v222_v53 = vunpack.c.l.b16 %v2039_v41 }
 0x107   :  { %v1762_v45 = vpop.eup %1761  ;;  %v2045_v46 = vpack.c.bf16 %v1760_v43, %v1760_v43  ;;  %v223_v47 = vunpack.c.l.b16 %v2041_v42 }
 0x108   :  { %v1764_v48 = vpop.eup %1763  ;;  %v2048_v49 = vpack.c.bf16 %v1762_v45, %v1762_v45  ;;  %v224_v50 = vunpack.c.l.b16 %v2043_v44 }
 0x109   :  { %v1766_v51 = vpop.eup %1765  ;;  %v2051_v52 = vpack.c.bf16 %v1764_v48, %v1764_v48  ;;  %v225_v54 = vunpack.c.l.b16 %v2045_v46  ;;  %v230_v55 = vrot.slane %v223_v47, 7  ;;  %v212_v47 = vld [vmem:[%s2767_s0 + $0x31] sm:$0x1] }
 0x10a   :  { %v1768_v56 = vpop.eup %1767  ;;  %v2055_v57 = vpack.c.bf16 %v1766_v51, %v1766_v51  ;;  %v226_v58 = vunpack.c.l.b16 %v2048_v49  ;;  %v233_v59 = vrot.slane %v224_v50, 6  ;;  %v213_v50 = vld [vmem:[%s2767_s0 + $0x39] sm:$0x1] }
 0x10b   :  { %v2058_v60 = vpack.c.bf16 %v1768_v56, %v1768_v56  ;;  %v227_v61 = vunpack.c.l.b16 %v2051_v52  ;;  %v232_v62 = vsel %vm231_vm1, %v230_v55, %v222_v53  ;;  %v236_v63 = vrot.slane %v225_v54, 5 }
 0x10c   :  { %v228_v9 = vunpack.c.l.b16 %v2055_v57  ;;  %v235_v10 = vsel %vm234_vm2, %v233_v59, %v232_v62  ;;  %v239_v11 = vrot.slane %v226_v58, 4 }
 0x10d   :  { %v229_v12 = vunpack.c.l.b16 %v2058_v60  ;;  %v238_v13 = vsel %vm237_vm3, %v236_v63, %v235_v10  ;;  %v242_v14 = vrot.slane %v227_v61, 3 }
 0x10e   :  { %v241_v15 = vsel %vm240_vm4, %v239_v11, %v238_v13  ;;  %v245_v16 = vrot.slane %v228_v9, 2 }
 0x10f   :  { %v244_v17 = vsel %vm243_vm5, %v242_v14, %v241_v15  ;;  %v248_v18 = vrot.slane %v229_v12, 1 }
 0x110   :  { %v247_v19 = vsel %vm246_vm6, %v245_v16, %v244_v17 }
 0x111   :  { %v250_v20 = vsel %vm249_vm7, %v248_v18, %v247_v19 }
 0x112   :  { %v251_v21 = vpack.c.b16 %v250_v20, %v250_v20 }
 0x114   :  { %1620 = vmatmul.mubr.bf16.vlgmr.msra.gmra.mrb[0].mxu1 %v251_v21 }
 0x115   :  { %1644 = vmatpush3.bf16.msra.mxu1 %v1920_v1  ;;  %1659 = vmatprep.mubr.msk.bf16.mxu1 %vm1890_vm0, %v1889_v0 }
 0x116   :  { %1645 = vmatprep.subr.bf16.mxu1 %v1889_v0 }
 0x119   :  { %1646 = vmatpush3.bf16.msra.mxu1 %v1931_v2 }
 0x11a   :  { %1647 = vmatprep.subr.bf16.mxu1 %v1889_v0 }
 0x11d   :  { %1648 = vmatpush3.bf16.msra.mxu1 %v1940_v3 }
 0x11e   :  { %1649 = vmatprep.subr.bf16.mxu1 %v1889_v0 }
 0x121   :  { %1650 = vmatpush3.bf16.msra.mxu1 %v1949_v4 }
 0x122   :  { %1651 = vmatprep.subr.bf16.mxu1 %v1889_v0 }
 0x125   :  { %1652 = vmatpush3.bf16.msra.mxu1 %v1958_v5 }
 0x126   :  { %1653 = vmatprep.subr.bf16.mxu1 %v1889_v0 }
 0x129   :  { %1654 = vmatpush3.bf16.msra.mxu1 %v1967_v6 }
 0x12a   :  { %1655 = vmatprep.subr.bf16.mxu1 %v1889_v0 }
 0x12d   :  { %1656 = vmatpush3.bf16.msra.mxu1 %v1976_v7 }
 0x12e   :  { %1657 = vmatprep.subr.bf16.mxu1 %v1889_v0 }
 0x131   :  { %1658 = vmatpush3.bf16.msra.mxu1 %v1985_v8 }
 0x132   :  { %1683 = vmatprep.subr.bf16.mxu1 %v1889_v0 }
 0x1e7   :  { %v287_v27 = vpop.f32.mrb[0].mxu1 }
 0x1e8   :  { %v294_v28 = vrot.slane %v287_v27, 1  ;;  %v295_v29 = vrot.slane %v287_v27, 2  ;;  %v296_v30 = vrot.slane %v287_v27, 3  ;;  %v297_v31 = vrot.slane %v287_v27, 4  ;;  %v1621_v32 = vpop.f32.mrb[1].mxu1 }
 0x1e9   :  { %v298_v34 = vrot.slane %v287_v27, 5  ;;  %v299_v35 = vrot.slane %v287_v27, 6  ;;  %v309_v36 = vadd.f32 %v287_v27, %v206_v22  ;;  %v290_v37 = vpop.f32.mrb[2].mxu1  ;;  %v300_v38 = vrot.slane %v287_v27, 7 }
 0x1ea   :  { %v310_v39 = vadd.f32 %v294_v28, %v207_v23  ;;  %v311_v40 = vadd.f32 %v295_v29, %v208_v24  ;;  %v312_v43 = vadd.f32 %v296_v30, %v209_v25  ;;  %v1622_v45 = vpop.f32.mrb[3].mxu1  ;;  %v313_v48 = vadd.f32 %v297_v31, %v210_v26 }
 0x1eb   :  { %1769 = vtanh.f32 %v309_v36  ;;  %v314_v51 = vadd.f32 %v298_v34, %v211_v33  ;;  %v315_v53 = vadd.f32 %v299_v35, %v212_v47  ;;  %v316_v54 = vadd.f32 %v300_v38, %v213_v50  ;;  %v347_v45 = vld [vmem:[%s2767_s0 + $0xa] sm:$0x1]  ;;  %v348_v47 = vld [vmem:[%s2767_s0 + $0x12] sm:$0x1]  ;;  %v350_v50 = vld [vmem:[%s2767_s0 + $0x22] sm:$0x1] }
 0x1ec   :  { %1771 = vtanh.f32 %v310_v39 }
 0x1ed   :  { %1773 = vtanh.f32 %v311_v40 }
 0x1ee   :  { %1775 = vtanh.f32 %v312_v43  ;;  %v346_v43 = vld [vmem:[%s2767_s0 + $0x2] sm:$0x1] }
 0x1ef   :  { %1777 = vtanh.f32 %v313_v48  ;;  %v349_v48 = vld [vmem:[%s2767_s0 + $0x1a] sm:$0x1] }
 0x1f0   :  { %1779 = vtanh.f32 %v314_v51 }
 0x1f1   :  { %1781 = vtanh.f32 %v315_v53 }
 0x1f2   :  { %1783 = vtanh.f32 %v316_v54 }
 0x1f5   :  { %v1770_v55 = vpop.eup %1769 }
 0x1f6   :  { %v1772_v56 = vpop.eup %1771  ;;  %v2112_v59 = vpack.c.bf16 %v1770_v55, %v1770_v55 }
 0x1f7   :  { %v1774_v58 = vpop.eup %1773  ;;  %v2114_v61 = vpack.c.bf16 %v1772_v56, %v1772_v56 }
 0x1f8   :  { %v1776_v62 = vpop.eup %1775  ;;  %v2116_v63 = vpack.c.bf16 %v1774_v58, %v1774_v58  ;;  %v362_v16 = vunpack.c.l.b16 %v2112_v59 }
 0x1f9   :  { %v1778_v9 = vpop.eup %1777  ;;  %v2118_v10 = vpack.c.bf16 %v1776_v62, %v1776_v62  ;;  %v363_v11 = vunpack.c.l.b16 %v2114_v61  ;;  %v351_v62 = vld [vmem:[%s2767_s0 + $0x2a] sm:$0x1] }
 0x1fa   :  { %v1780_v12 = vpop.eup %1779  ;;  %v2121_v13 = vpack.c.bf16 %v1778_v9, %v1778_v9  ;;  %v364_v14 = vunpack.c.l.b16 %v2116_v63 }
 0x1fb   :  { %v1782_v15 = vpop.eup %1781  ;;  %v2125_v17 = vpack.c.bf16 %v1780_v12, %v1780_v12  ;;  %v365_v18 = vunpack.c.l.b16 %v2118_v10  ;;  %v370_v19 = vrot.slane %v363_v11, 7 }
 0x1fc   :  { %v1784_v20 = vpop.eup %1783  ;;  %v2128_v21 = vpack.c.bf16 %v1782_v15, %v1782_v15  ;;  %v366_v22 = vunpack.c.l.b16 %v2121_v13  ;;  %v372_v23 = vrot.slane %v364_v14, 6 }
 0x1fd   :  { %v2131_v24 = vpack.c.bf16 %v1784_v20, %v1784_v20  ;;  %v367_v25 = vunpack.c.l.b16 %v2125_v17  ;;  %v371_v26 = vsel %vm231_vm1, %v370_v19, %v362_v16  ;;  %v374_v27 = vrot.slane %v365_v18, 5 }
 0x1fe   :  { %v368_v28 = vunpack.c.l.b16 %v2128_v21  ;;  %v373_v29 = vsel %vm234_vm2, %v372_v23, %v371_v26  ;;  %v376_v30 = vrot.slane %v366_v22, 4  ;;  %v352_v22 = vld [vmem:[%s2767_s0 + $0x32] sm:$0x1] }
 0x1ff   :  { %v369_v31 = vunpack.c.l.b16 %v2131_v24  ;;  %v375_v32 = vsel %vm237_vm3, %v374_v27, %v373_v29  ;;  %v378_v33 = vrot.slane %v367_v25, 3  ;;  %v353_v25 = vld [vmem:[%s2767_s0 + $0x3a] sm:$0x1]  ;;  %v1145_v29 = vshll.u32 %v2112_v59, 16 }
 0x200   :  { %v377_v34 = vsel %vm240_vm4, %v376_v30, %v375_v32  ;;  %v380_v35 = vrot.slane %v368_v28, 2  ;;  %v1148_v30 = vshll.u32 %v2114_v61, 16  ;;  %v1166_v59 = vshll.u32 %v2131_v24, 16 }
 0x201   :  { %v379_v36 = vsel %vm243_vm5, %v378_v33, %v377_v34  ;;  %v382_v37 = vrot.slane %v369_v31, 1  ;;  %v1151_v31 = vshll.u32 %v2116_v63, 16  ;;  %v1154_v33 = vshll.u32 %v2118_v10, 16 }
 0x202   :  { %v381_v38 = vsel %vm246_vm6, %v380_v35, %v379_v36  ;;  %v1157_v34 = vshll.u32 %v2121_v13, 16  ;;  %v1160_v35 = vshll.u32 %v2125_v17, 16  ;;  %v1163_v36 = vshll.u32 %v2128_v21, 16 }
 0x203   :  { %v383_v39 = vsel %vm249_vm7, %v382_v37, %v381_v38  ;;  %v1323_v63 = vsel %vm2189_vm10, %v2039_v41, %v1145_v29  ;;  %v1324_v38 = vsel %vm2189_vm10, %v2041_v42, %v1148_v30  ;;  %v1325_v10 = vsel %vm2189_vm10, %v2043_v44, %v1151_v31 }
 0x204   :  { %v384_v40 = vpack.c.b16 %v383_v39, %v383_v39  ;;  %v1326_v21 = vsel %vm2189_vm10, %v2045_v46, %v1154_v33  ;;  %v1327_v24 = vsel %vm2189_vm10, %v2048_v49, %v1157_v34  ;;  %v1328_v41 = vsel %vm2189_vm10, %v2051_v52, %v1160_v35 }
 0x205   :  { %v1329_v44 = vsel %vm2189_vm10, %v2055_v57, %v1163_v36 }
 0x206   :  { %1640 = vmatmul.mubr.bf16.vlgmr.msra.gmra.mrb[4].mxu0 %v384_v40  ;;  %v1330_v40 = vsel %vm2189_vm10, %v2058_v60, %v1166_v59 }
 0x207   :  { %1664 = vmatpush3.bf16.msra.mxu0 %v1920_v1  ;;  %1679 = vmatprep.mubr.msk.bf16.mxu0 %vm1890_vm0, %v1889_v0 }
 0x208   :  { %1665 = vmatprep.subr.bf16.mxu0 %v1889_v0 }
 0x20b   :  { %1666 = vmatpush3.bf16.msra.mxu0 %v1931_v2 }
 0x20c   :  { %1667 = vmatprep.subr.bf16.mxu0 %v1889_v0 }
 0x20f   :  { %1668 = vmatpush3.bf16.msra.mxu0 %v1940_v3 }
 0x210   :  { %1669 = vmatprep.subr.bf16.mxu0 %v1889_v0 }
 0x213   :  { %1670 = vmatpush3.bf16.msra.mxu0 %v1949_v4 }
 0x214   :  { %1671 = vmatprep.subr.bf16.mxu0 %v1889_v0 }
 0x217   :  { %1672 = vmatpush3.bf16.msra.mxu0 %v1958_v5 }
 0x218   :  { %1673 = vmatprep.subr.bf16.mxu0 %v1889_v0 }
 0x21b   :  { %1674 = vmatpush3.bf16.msra.mxu0 %v1967_v6 }
 0x21c   :  { %1675 = vmatprep.subr.bf16.mxu0 %v1889_v0 }
 0x21f   :  { %1676 = vmatpush3.bf16.msra.mxu0 %v1976_v7 }
 0x220   :  { %1677 = vmatprep.subr.bf16.mxu0 %v1889_v0 }
 0x223   :  { %1678 = vmatpush3.bf16.msra.mxu0 %v1985_v8 }
 0x224   :  { %1703 = vmatprep.subr.bf16.mxu0 %v1889_v0 }
 0x2d9   :  { %v420_v51 = vpop.f32.mrb[4].mxu0 }
 0x2da   :  { %v427_v53 = vrot.slane %v420_v51, 1  ;;  %v428_v54 = vrot.slane %v420_v51, 2  ;;  %v429_v55 = vrot.slane %v420_v51, 3  ;;  %v430_v56 = vrot.slane %v420_v51, 4  ;;  %v1641_v58 = vpop.f32.mrb[5].mxu0 }
 0x2db   :  { %v431_v9 = vrot.slane %v420_v51, 5  ;;  %v432_v11 = vrot.slane %v420_v51, 6  ;;  %v442_v12 = vadd.f32 %v420_v51, %v346_v43  ;;  %v423_v14 = vpop.f32.mrb[6].mxu0  ;;  %v433_v15 = vrot.slane %v420_v51, 7 }
 0x2dc   :  { %v443_v16 = vadd.f32 %v427_v53, %v347_v45  ;;  %v444_v18 = vadd.f32 %v428_v54, %v348_v47  ;;  %v445_v19 = vadd.f32 %v429_v55, %v349_v48  ;;  %v1642_v20 = vpop.f32.mrb[7].mxu0  ;;  %v446_v23 = vadd.f32 %v430_v56, %v350_v50 }
 0x2dd   :  { %1785 = vtanh.f32 %v442_v12  ;;  %v447_v26 = vadd.f32 %v431_v9, %v351_v62  ;;  %v448_v27 = vadd.f32 %v432_v11, %v352_v22  ;;  %v449_v28 = vadd.f32 %v433_v15, %v353_v25 }
 0x2de   :  { %1787 = vtanh.f32 %v443_v16 }
 0x2df   :  { %1789 = vtanh.f32 %v444_v18 }
 0x2e0   :  { %1791 = vtanh.f32 %v445_v19 }
 0x2e1   :  { %1793 = vtanh.f32 %v446_v23 }
 0x2e2   :  { %1795 = vtanh.f32 %v447_v26 }
 0x2e3   :  { %1797 = vtanh.f32 %v448_v27 }
 0x2e4   :  { %1799 = vtanh.f32 %v449_v28 }
 0x2e7   :  { %v1786_v37 = vpop.eup %1785 }
 0x2e8   :  { %v1788_v61 = vpop.eup %1787  ;;  %v458_v13 = vpack.c.bf16 %v1786_v37, %v1786_v37 }
 0x2e9   :  { %v1790_v17 = vpop.eup %1789  ;;  %v459_v39 = vpack.c.bf16 %v1788_v61, %v1788_v61 }
 0x2ea   :  { %v1792_v42 = vpop.eup %1791  ;;  %v460_v43 = vpack.c.bf16 %v1790_v17, %v1790_v17  ;;  %v1176_v46 = vrot.slane %v458_v13, 7  ;;  %v495_v47 = vunpack.c.l.b16 %v458_v13 }
 0x2eb   :  { %v1794_v45 = vpop.eup %1793  ;;  %v1177_v48 = vrot.slane %v459_v39, 7  ;;  %v461_v49 = vpack.c.bf16 %v1792_v42, %v1792_v42  ;;  %v496_v50 = vunpack.c.l.b16 %v459_v39  ;;  %v482_v42 = vld [vmem:[%s2767_s0 + $0x1b] sm:$0x1] }
 0x2ec   :  { %v1796_v51 = vpop.eup %1795  ;;  %v1178_v53 = vrot.slane %v460_v43, 7  ;;  %v2223_v52 = vsel %vm1320_vm8, %v1323_v63, %v1176_v46  ;;  %v462_v54 = vpack.c.bf16 %v1794_v45, %v1794_v45  ;;  %v497_v55 = vunpack.c.l.b16 %v460_v43 }
 0x2ed   :  { %v1798_v56 = vpop.eup %1797  ;;  %v2226_v57 = vsel %vm1320_vm8, %v1324_v38, %v1177_v48  ;;  %v463_v58 = vpack.c.bf16 %v1796_v51, %v1796_v51  ;;  %v498_v60 = vunpack.c.l.b16 %v461_v49  ;;  %v503_v62 = vrot.slane %v496_v50, 7 }
 0x2ee   :  { %v1800_v9 = vpop.eup %1799  ;;  %v2229_v11 = vsel %vm1320_vm8, %v1325_v10, %v1178_v53  ;;  %v464_v12 = vpack.c.bf16 %v1798_v56, %v1798_v56  ;;  %v499_v14 = vunpack.c.l.b16 %v462_v54  ;;  %v505_v15 = vrot.slane %v497_v55, 6 }
 0x2ef   :  { %v465_v16 = vpack.c.bf16 %v1800_v9, %v1800_v9  ;;  %v500_v18 = vunpack.c.l.b16 %v463_v58  ;;  %v504_v19 = vsel %vm231_vm1, %v503_v62, %v495_v47  ;;  %v507_v20 = vrot.slane %v498_v60, 5  ;;  %v485_v9 = vld [vmem:[%s2767_s0 + $0x33] sm:$0x1] }
 0x2f0   :  { %v501_v22 = vunpack.c.l.b16 %v464_v12  ;;  %v506_v23 = vsel %vm234_vm2, %v505_v15, %v504_v19  ;;  %v509_v25 = vrot.slane %v499_v14, 4  ;;  %v1179_v26 = vrot.slane %v461_v49, 7  ;;  %v484_v49 = vld [vmem:[%s2767_s0 + $0x2b] sm:$0x1]  ;;  %v486_v14 = vld [vmem:[%s2767_s0 + $0x3b] sm:$0x1] }
 0x2f1   :  { %v502_v27 = vunpack.c.l.b16 %v465_v16  ;;  %v508_v28 = vsel %vm237_vm3, %v507_v20, %v506_v23  ;;  %v511_v29 = vrot.slane %v500_v18, 3  ;;  %v1180_v30 = vrot.slane %v462_v54, 7 }
 0x2f2   :  { %v510_v31 = vsel %vm240_vm4, %v509_v25, %v508_v28  ;;  %v513_v32 = vrot.slane %v501_v22, 2  ;;  %v1181_v33 = vrot.slane %v463_v58, 7  ;;  %v1182_v34 = vrot.slane %v464_v12, 7 }
 0x2f3   :  { %v512_v35 = vsel %vm243_vm5, %v511_v29, %v510_v31  ;;  %v515_v36 = vrot.slane %v502_v27, 1  ;;  %v1183_v59 = vrot.slane %v465_v16, 7  ;;  %v2237_v37 = vsel %vm1320_vm8, %v1326_v21, %v1179_v26  ;;  %v479_v21 = vld [vmem:[%s2767_s0 + $0x3] sm:$0x1] }
 0x2f4   :  { %v514_v61 = vsel %vm246_vm6, %v513_v32, %v512_v35  ;;  %v2241_v63 = vsel %vm1320_vm8, %v1327_v24, %v1180_v30  ;;  %v2244_v38 = vsel %vm1320_vm8, %v1328_v41, %v1181_v33  ;;  %v2247_v10 = vsel %vm1320_vm8, %v1329_v44, %v1182_v34  ;;  %v480_v24 = vld [vmem:[%s2767_s0 + $0xb] sm:$0x1]  ;;  %v481_v41 = vld [vmem:[%s2767_s0 + $0x13] sm:$0x1]  ;;  %v483_v44 = vld [vmem:[%s2767_s0 + $0x23] sm:$0x1] }
 0x2f5   :  { %v516_v13 = vsel %vm249_vm7, %v515_v36, %v514_v61  ;;  %v2251_v17 = vsel %vm1320_vm8, %v1330_v40, %v1183_v59  ;;  %v1884_v32 = vld [vmem:[%s2765_s1 + $0x18] sm:$0xff]   ;;  %vm1452_vm8 = vcmask 1043456  }
 0x2f6   :  { %v517_v39 = vpack.c.b16 %v516_v13, %v516_v13  ;;  %vm2703_vm10 = vmand %vm1452_vm8, %vm1453_vm9 }
 0x2f8   :  { %1660 = vmatmul.mubr.bf16.vlgmr.msra.gmra.mrb[4].mxu1 %v517_v39 }
 0x2f9   :  { %1684 = vmatpush3.bf16.msra.mxu1 %v1920_v1  ;;  %1699 = vmatprep.mubr.msk.bf16.mxu1 %vm1890_vm0, %v1889_v0 }
 0x2fa   :  { %1685 = vmatprep.subr.bf16.mxu1 %v1889_v0 }
 0x2fd   :  { %1686 = vmatpush3.bf16.msra.mxu1 %v1931_v2 }
 0x2fe   :  { %1687 = vmatprep.subr.bf16.mxu1 %v1889_v0 }
 0x301   :  { %1688 = vmatpush3.bf16.msra.mxu1 %v1940_v3 }
 0x302   :  { %1689 = vmatprep.subr.bf16.mxu1 %v1889_v0 }
 0x305   :  { %1690 = vmatpush3.bf16.msra.mxu1 %v1949_v4 }
 0x306   :  { %1691 = vmatprep.subr.bf16.mxu1 %v1889_v0 }
 0x309   :  { %1692 = vmatpush3.bf16.msra.mxu1 %v1958_v5 }
 0x30a   :  { %1693 = vmatprep.subr.bf16.mxu1 %v1889_v0 }
 0x30d   :  { %1694 = vmatpush3.bf16.msra.mxu1 %v1967_v6 }
 0x30e   :  { %1695 = vmatprep.subr.bf16.mxu1 %v1889_v0 }
 0x311   :  { %1696 = vmatpush3.bf16.msra.mxu1 %v1976_v7 }
 0x312   :  { %1697 = vmatprep.subr.bf16.mxu1 %v1889_v0 }
 0x315   :  { %1698 = vmatpush3.bf16.msra.mxu1 %v1985_v8 }
 0x316   :  { %1723 = vmatprep.subr.bf16.mxu1 %v1889_v0 }
 0x3cb   :  { %v553_v40 = vpop.f32.mrb[4].mxu1 }
 0x3cc   :  { %v560_v43 = vrot.slane %v553_v40, 1  ;;  %v561_v46 = vrot.slane %v553_v40, 2  ;;  %v562_v45 = vrot.slane %v553_v40, 3  ;;  %v563_v47 = vrot.slane %v553_v40, 4  ;;  %v1661_v48 = vpop.f32.mrb[5].mxu1 }
 0x3cd   :  { %v564_v50 = vrot.slane %v553_v40, 5  ;;  %v565_v51 = vrot.slane %v553_v40, 6  ;;  %v575_v53 = vadd.f32 %v553_v40, %v479_v21  ;;  %v556_v54 = vpop.f32.mrb[6].mxu1  ;;  %v566_v55 = vrot.slane %v553_v40, 7 }
 0x3ce   :  { %v576_v56 = vadd.f32 %v560_v43, %v480_v24  ;;  %v577_v58 = vadd.f32 %v561_v46, %v481_v41  ;;  %v578_v60 = vadd.f32 %v562_v45, %v482_v42  ;;  %v1662_v62 = vpop.f32.mrb[7].mxu1  ;;  %v579_v12 = vadd.f32 %v563_v47, %v483_v44 }
 0x3cf   :  { %1801 = vtanh.f32 %v575_v53  ;;  %v580_v15 = vadd.f32 %v564_v50, %v484_v49  ;;  %v581_v16 = vadd.f32 %v565_v51, %v485_v9  ;;  %v582_v18 = vadd.f32 %v566_v55, %v486_v14 }
 0x3d0   :  { %1803 = vtanh.f32 %v576_v56 }
 0x3d1   :  { %1805 = vtanh.f32 %v577_v58 }
 0x3d2   :  { %1807 = vtanh.f32 %v578_v60 }
 0x3d3   :  { %1809 = vtanh.f32 %v579_v12 }
 0x3d4   :  { %1811 = vtanh.f32 %v580_v15 }
 0x3d5   :  { %1813 = vtanh.f32 %v581_v16 }
 0x3d6   :  { %1815 = vtanh.f32 %v582_v18 }
 0x3d9   :  { %v1802_v19 = vpop.eup %1801 }
 0x3da   :  { %v1804_v20 = vpop.eup %1803  ;;  %v591_v22 = vpack.c.bf16 %v1802_v19, %v1802_v19 }
 0x3db   :  { %v1806_v23 = vpop.eup %1805  ;;  %v592_v25 = vpack.c.bf16 %v1804_v20, %v1804_v20 }
 0x3dc   :  { %v1808_v26 = vpop.eup %1807  ;;  %v593_v27 = vpack.c.bf16 %v1806_v23, %v1806_v23  ;;  %v1185_v28 = vshll.u32 %v591_v22, 16  ;;  %v628_v30 = vunpack.c.l.b16 %v591_v22 }
 0x3dd   :  { %v1810_v29 = vpop.eup %1809  ;;  %v1189_v31 = vshll.u32 %v592_v25, 16  ;;  %v594_v33 = vpack.c.bf16 %v1808_v26, %v1808_v26  ;;  %v629_v34 = vunpack.c.l.b16 %v592_v25 }
 0x3de   :  { %v1812_v35 = vpop.eup %1811  ;;  %v2300_v36 = vrot.slane %v1185_v28, 7  ;;  %v1193_v59 = vshll.u32 %v593_v27, 16  ;;  %v595_v61 = vpack.c.bf16 %v1810_v29, %v1810_v29  ;;  %v630_v13 = vunpack.c.l.b16 %v593_v27 }
 0x3df   :  { %v1814_v39 = vpop.eup %1813  ;;  %v2302_v21 = vrot.slane %v1189_v31, 7  ;;  %v596_v24 = vpack.c.bf16 %v1812_v35, %v1812_v35  ;;  %v631_v41 = vunpack.c.l.b16 %v594_v33  ;;  %v636_v42 = vrot.slane %v629_v34, 7 }
 0x3e0   :  { %v1816_v44 = vpop.eup %1815  ;;  %v2304_v40 = vrot.slane %v1193_v59, 7  ;;  %v1367_v43 = vsel %vm2296_vm13, %v2223_v52, %v2300_v36  ;;  %v597_v46 = vpack.c.bf16 %v1814_v39, %v1814_v39  ;;  %v632_v45 = vunpack.c.l.b16 %v595_v61 }
 0x3e1   :  { %v1368_v47 = vsel %vm2296_vm13, %v2226_v57, %v2302_v21  ;;  %v598_v48 = vpack.c.bf16 %v1816_v44, %v1816_v44  ;;  %v633_v49 = vunpack.c.l.b16 %v596_v24  ;;  %v637_v50 = vsel %vm231_vm1, %v636_v42, %v628_v30  ;;  %v617_v42 = vld [vmem:[%s2767_s0 + $0x2c] sm:$0x1] }
 0x3e2   :  { %v1369_v51 = vsel %vm2296_vm13, %v2229_v11, %v2304_v40  ;;  %v634_v53 = vunpack.c.l.b16 %v597_v46  ;;  %v638_v54 = vrot.slane %v630_v13, 6  ;;  %v640_v56 = vrot.slane %v631_v41, 5 }
 0x3e3   :  { %v635_v55 = vunpack.c.l.b16 %v598_v48  ;;  %v642_v58 = vrot.slane %v632_v45, 4  ;;  %v1197_v60 = vshll.u32 %v594_v33, 16  ;;  %v644_v9 = vrot.slane %v633_v49, 3 }
 0x3e4   :  { %v639_v62 = vsel %vm234_vm2, %v638_v54, %v637_v50  ;;  %v1201_v12 = vshll.u32 %v595_v61, 16  ;;  %v1205_v14 = vshll.u32 %v596_v24, 16  ;;  %v646_v16 = vrot.slane %v634_v53, 2 }
 0x3e5   :  { %v641_v15 = vsel %vm237_vm3, %v640_v56, %v639_v62  ;;  %v2321_v18 = vrot.slane %v1197_v60, 7  ;;  %v1209_v19 = vshll.u32 %v597_v46, 16  ;;  %v1213_v25 = vshll.u32 %v598_v48, 16  ;;  %v618_v56 = vld [vmem:[%s2767_s0 + $0x34] sm:$0x1] }
 0x3e6   :  { %v643_v20 = vsel %vm240_vm4, %v642_v58, %v641_v15  ;;  %v2324_v22 = vrot.slane %v1201_v12, 7  ;;  %v2326_v23 = vrot.slane %v1205_v14, 7  ;;  %v648_v27 = vrot.slane %v635_v55, 1  ;;  %v619_v60 = vld [vmem:[%s2767_s0 + $0x3c] sm:$0x1] }
 0x3e7   :  { %v645_v26 = vsel %vm243_vm5, %v644_v9, %v643_v20  ;;  %v2329_v28 = vrot.slane %v1209_v19, 7  ;;  %v1370_v29 = vsel %vm2296_vm13, %v2237_v37, %v2321_v18  ;;  %v2336_v31 = vrot.slane %v1213_v25, 7 }
 0x3e8   :  { %v647_v30 = vsel %vm246_vm6, %v646_v16, %v645_v26  ;;  %v1371_v33 = vsel %vm2296_vm13, %v2241_v63, %v2324_v22  ;;  %v1372_v34 = vsel %vm2296_vm13, %v2244_v38, %v2326_v23  ;;  %v1881_v23 = vld [vmem:[%s2765_s1] sm:$0xff]  }
 0x3e9   :  { %v649_v35 = vsel %vm249_vm7, %v648_v27, %v647_v30  ;;  %v1373_v59 = vsel %vm2296_vm13, %v2247_v10, %v2329_v28  ;;  %v1374_v13 = vsel %vm2296_vm13, %v2251_v17, %v2336_v31  ;;  %v1882_v10 = vld [vmem:[%s2765_s1 + $0x8] sm:$0xff]   ;;  %v1883_v17 = vld [vmem:[%s2765_s1 + $0x10] sm:$0xff]   ;;  %v1885_v28 = vld [vmem:[%s2765_s1 + $0x20] sm:$0xff]  }
 0x3ea   :  { %v650_v61 = vpack.c.b16 %v649_v35, %v649_v35  ;;  %v1887_v31 = vld [vmem:[%s2765_s1 + $0x30] sm:$0xff]  }
 0x3ec   :  { %1680 = vmatmul.mubr.bf16.vlgmr.msra.gmra.mrb[8].mxu0 %v650_v61 }
 0x3ed   :  { %1704 = vmatpush3.bf16.msra.mxu0 %v1920_v1  ;;  %1719 = vmatprep.mubr.msk.bf16.mxu0 %vm1890_vm0, %v1889_v0  ;;  %v612_v1 = vld [vmem:[%s2767_s0 + $0x4] sm:$0x1] }
 0x3ee   :  { %1705 = vmatprep.subr.bf16.mxu0 %v1889_v0 }
 0x3f1   :  { %1706 = vmatpush3.bf16.msra.mxu0 %v1931_v2  ;;  %v613_v2 = vld [vmem:[%s2767_s0 + $0xc] sm:$0x1] }
 0x3f2   :  { %1707 = vmatprep.subr.bf16.mxu0 %v1889_v0 }
 0x3f5   :  { %1708 = vmatpush3.bf16.msra.mxu0 %v1940_v3  ;;  %v614_v3 = vld [vmem:[%s2767_s0 + $0x14] sm:$0x1] }
 0x3f6   :  { %1709 = vmatprep.subr.bf16.mxu0 %v1889_v0 }
 0x3f9   :  { %1710 = vmatpush3.bf16.msra.mxu0 %v1949_v4  ;;  %v615_v4 = vld [vmem:[%s2767_s0 + $0x1c] sm:$0x1] }
 0x3fa   :  { %1711 = vmatprep.subr.bf16.mxu0 %v1889_v0 }
 0x3fd   :  { %1712 = vmatpush3.bf16.msra.mxu0 %v1958_v5  ;;  %v616_v5 = vld [vmem:[%s2767_s0 + $0x24] sm:$0x1] }
 0x3fe   :  { %1713 = vmatprep.subr.bf16.mxu0 %v1889_v0 }
 0x401   :  { %1714 = vmatpush3.bf16.msra.mxu0 %v1967_v6 }
 0x402   :  { %1715 = vmatprep.subr.bf16.mxu0 %v1889_v0 }
 0x405   :  { %1716 = vmatpush3.bf16.msra.mxu0 %v1976_v7 }
 0x406   :  { %1717 = vmatprep.subr.bf16.mxu0 %v1889_v0 }
 0x409   :  { %1718 = vmatpush3.bf16.msra.mxu0 %v1985_v8 }
 0x4bf   :  { %v686_v6 = vpop.f32.mrb[8].mxu0 }
 0x4c0   :  { %v693_v7 = vrot.slane %v686_v6, 1  ;;  %v694_v8 = vrot.slane %v686_v6, 2  ;;  %v695_v39 = vrot.slane %v686_v6, 3  ;;  %v696_v24 = vrot.slane %v686_v6, 4  ;;  %v1681_v41 = vpop.f32.mrb[9].mxu0 }
 0x4c1   :  { %v697_v44 = vrot.slane %v686_v6, 5  ;;  %v698_v46 = vrot.slane %v686_v6, 6  ;;  %v708_v45 = vadd.f32 %v686_v6, %v612_v1  ;;  %v689_v48 = vpop.f32.mrb[10].mxu0  ;;  %v699_v49 = vrot.slane %v686_v6, 7 }
 0x4c2   :  { %v709_v50 = vadd.f32 %v693_v7, %v613_v2  ;;  %v710_v53 = vadd.f32 %v694_v8, %v614_v3  ;;  %v711_v54 = vadd.f32 %v695_v39, %v615_v4  ;;  %v1682_v55 = vpop.f32.mrb[11].mxu0  ;;  %v712_v58 = vadd.f32 %v696_v24, %v616_v5 }
 0x4c3   :  { %1817 = vtanh.f32 %v708_v45  ;;  %v713_v62 = vadd.f32 %v697_v44, %v617_v42  ;;  %v714_v9 = vadd.f32 %v698_v46, %v618_v56  ;;  %v715_v12 = vadd.f32 %v699_v49, %v619_v60 }
 0x4c4   :  { %1819 = vtanh.f32 %v709_v50 }
 0x4c5   :  { %1821 = vtanh.f32 %v710_v53 }
 0x4c6   :  { %1823 = vtanh.f32 %v711_v54 }
 0x4c7   :  { %1825 = vtanh.f32 %v712_v58 }
 0x4c8   :  { %1827 = vtanh.f32 %v713_v62 }
 0x4c9   :  { %1829 = vtanh.f32 %v714_v9 }
 0x4ca   :  { %1831 = vtanh.f32 %v715_v12 }
 0x4cd   :  { %v1818_v14 = vpop.eup %1817 }
 0x4ce   :  { %v1820_v15 = vpop.eup %1819  ;;  %v724_v16 = vpack.c.bf16 %v1818_v14, %v1818_v14 }
 0x4cf   :  { %v1822_v19 = vpop.eup %1821  ;;  %v725_v20 = vpack.c.bf16 %v1820_v15, %v1820_v15 }
 0x4d0   :  { %v1824_v25 = vpop.eup %1823  ;;  %v726_v26 = vpack.c.bf16 %v1822_v19, %v1822_v19  ;;  %v1224_v27 = vrot.slane %v724_v16, 6  ;;  %v761_v35 = vunpack.c.l.b16 %v724_v16  ;;  %v749_v19 = vld [vmem:[%s2767_s0 + $0x25] sm:$0x1] }
 0x4d1   :  { %v1826_v30 = vpop.eup %1825  ;;  %v1225_v61 = vrot.slane %v725_v20, 6  ;;  %v727_v1 = vpack.c.bf16 %v1824_v25, %v1824_v25  ;;  %v762_v2 = vunpack.c.l.b16 %v725_v20 }
 0x4d2   :  { %v1828_v3 = vpop.eup %1827  ;;  %v1226_v4 = vrot.slane %v726_v26, 6  ;;  %v2402_v5 = vsel %vm1364_vm11, %v1367_v43, %v1224_v27  ;;  %v728_v6 = vpack.c.bf16 %v1826_v30, %v1826_v30  ;;  %v763_v7 = vunpack.c.l.b16 %v726_v26 }
 0x4d3   :  { %v1830_v8 = vpop.eup %1829  ;;  %v2410_v39 = vsel %vm1364_vm11, %v1368_v47, %v1225_v61  ;;  %v729_v24 = vpack.c.bf16 %v1828_v3, %v1828_v3  ;;  %v764_v41 = vunpack.c.l.b16 %v727_v1  ;;  %v769_v42 = vrot.slane %v762_v2, 7  ;;  %v750_v61 = vld [vmem:[%s2767_s0 + $0x2d] sm:$0x1] }
 0x4d4   :  { %v1832_v44 = vpop.eup %1831  ;;  %v2418_v52 = vsel %vm1364_vm11, %v1369_v51, %v1226_v4  ;;  %v730_v36 = vpack.c.bf16 %v1830_v8, %v1830_v8  ;;  %v765_v43 = vunpack.c.l.b16 %v728_v6  ;;  %v771_v46 = vrot.slane %v763_v7, 6 }
 0x4d5   :  { %v731_v45 = vpack.c.bf16 %v1832_v44, %v1832_v44  ;;  %v766_v57 = vunpack.c.l.b16 %v729_v24  ;;  %v770_v21 = vsel %vm231_vm1, %v769_v42, %v761_v35  ;;  %v773_v47 = vrot.slane %v764_v41, 5  ;;  %v751_v42 = vld [vmem:[%s2767_s0 + $0x35] sm:$0x1] }
 0x4d6   :  { %v767_v48 = vunpack.c.l.b16 %v730_v36  ;;  %v772_v49 = vsel %vm234_vm2, %v771_v46, %v770_v21  ;;  %v775_v50 = vrot.slane %v765_v43, 4  ;;  %v1227_v53 = vrot.slane %v727_v1, 6 }
 0x4d7   :  { %v768_v54 = vunpack.c.l.b16 %v731_v45  ;;  %v774_v55 = vsel %vm237_vm3, %v773_v47, %v772_v49  ;;  %v777_v11 = vrot.slane %v766_v57, 3  ;;  %v1228_v40 = vrot.slane %v728_v6, 6 }
 0x4d8   :  { %v776_v51 = vsel %vm240_vm4, %v775_v50, %v774_v55  ;;  %v779_v56 = vrot.slane %v767_v48, 2  ;;  %v1229_v58 = vrot.slane %v729_v24, 6  ;;  %v1230_v60 = vrot.slane %v730_v36, 6  ;;  %v752_v36 = vld [vmem:[%s2767_s0 + $0x3d] sm:$0x1] }
 0x4d9   :  { %v778_v62 = vsel %vm243_vm5, %v777_v11, %v776_v51  ;;  %v781_v9 = vrot.slane %v768_v54, 1  ;;  %v1231_v12 = vrot.slane %v731_v45, 6  ;;  %v2431_v14 = vsel %vm1364_vm11, %v1370_v29, %v1227_v53  ;;  %v1886_v29 = vld [vmem:[%s2765_s1 + $0x28] sm:$0xff]   ;;  %v1013_v51 = vld [vmem:[%s2767_s0 + $0x17] sm:$0x1] }
 0x4da   :  { %v780_v15 = vsel %vm246_vm6, %v779_v56, %v778_v62  ;;  %v2440_v16 = vsel %vm1364_vm11, %v1371_v33, %v1228_v40  ;;  %v2448_v37 = vsel %vm1364_vm11, %v1372_v34, %v1229_v58  ;;  %v2456_v18 = vsel %vm1364_vm11, %v1373_v59, %v1230_v60  ;;  %v1888_v33 = vld [vmem:[%s2765_s1 + $0x38] sm:$0xff]   ;;  %v745_v34 = vld [vmem:[%s2767_s0 + $0x5] sm:$0x1]  ;;  %v746_v59 = vld [vmem:[%s2767_s0 + $0xd] sm:$0x1] }
 0x4db   :  { %v782_v63 = vsel %vm249_vm7, %v781_v9, %v780_v15  ;;  %v2465_v38 = vsel %vm1364_vm11, %v1374_v13, %v1231_v12  ;;  %v747_v13 = vld [vmem:[%s2767_s0 + $0x15] sm:$0x1] }
 0x4dc   :  { %v783_v22 = vpack.c.b16 %v782_v63, %v782_v63 }
 0x4de   :  { %1700 = vmatmul.mubr.bf16.vlgmr.msra.gmra.mrb[8].mxu1 %v783_v22 }
 0x4df   :  { %1724 = vmatpush3.bf16.msra.mxu1 %v1881_v23  ;;  %1739 = vmatprep.mubr.msk.bf16.mxu1 %vm1890_vm0, %v1889_v0  ;;  %vm2525_vm0 = vmand %vm1408_vm14, %vm1409_vm15 }
 0x4e0   :  { %1725 = vmatprep.subr.bf16.mxu1 %v1889_v0 }
 0x4e3   :  { %1726 = vmatpush3.bf16.msra.mxu1 %v1882_v10 }
 0x4e4   :  { %1727 = vmatprep.subr.bf16.mxu1 %v1889_v0 }
 0x4e7   :  { %1728 = vmatpush3.bf16.msra.mxu1 %v1883_v17 }
 0x4e8   :  { %1729 = vmatprep.subr.bf16.mxu1 %v1889_v0 }
 0x4eb   :  { %1730 = vmatpush3.bf16.msra.mxu1 %v1884_v32 }
 0x4ec   :  { %1731 = vmatprep.subr.bf16.mxu1 %v1889_v0 }
 0x4ef   :  { %1732 = vmatpush3.bf16.msra.mxu1 %v1885_v28 }
 0x4f0   :  { %1733 = vmatprep.subr.bf16.mxu1 %v1889_v0 }
 0x4f3   :  { %1734 = vmatpush3.bf16.msra.mxu1 %v1886_v29 }
 0x4f4   :  { %1735 = vmatprep.subr.bf16.mxu1 %v1889_v0 }
 0x4f7   :  { %1736 = vmatpush3.bf16.msra.mxu1 %v1887_v31 }
 0x4f8   :  { %1737 = vmatprep.subr.bf16.mxu1 %v1889_v0  ;;  %v748_v0 = vld [vmem:[%s2767_s0 + $0x1d] sm:$0x1] }
 0x4fb   :  { %1738 = vmatpush3.bf16.msra.mxu1 %v1888_v33 }
 0x5b1   :  { %v819_v20 = vpop.f32.mrb[8].mxu1 }
 0x5b2   :  { %v826_v25 = vrot.slane %v819_v20, 1  ;;  %v827_v26 = vrot.slane %v819_v20, 2  ;;  %v828_v27 = vrot.slane %v819_v20, 3  ;;  %v829_v30 = vrot.slane %v819_v20, 4  ;;  %v1701_v35 = vpop.f32.mrb[9].mxu1 }
 0x5b3   :  { %v830_v1 = vrot.slane %v819_v20, 5  ;;  %v831_v2 = vrot.slane %v819_v20, 6  ;;  %v841_v3 = vadd.f32 %v819_v20, %v745_v34  ;;  %v822_v4 = vpop.f32.mrb[10].mxu1  ;;  %v832_v6 = vrot.slane %v819_v20, 7 }
 0x5b4   :  { %v842_v7 = vadd.f32 %v826_v25, %v746_v59  ;;  %v843_v8 = vadd.f32 %v827_v26, %v747_v13  ;;  %v844_v24 = vadd.f32 %v828_v27, %v748_v0  ;;  %v1702_v41 = vpop.f32.mrb[11].mxu1  ;;  %v845_v44 = vadd.f32 %v829_v30, %v749_v19 }
 0x5b5   :  { %1833 = vtanh.f32 %v841_v3  ;;  %v846_v43 = vadd.f32 %v830_v1, %v750_v61  ;;  %v847_v46 = vadd.f32 %v831_v2, %v751_v42  ;;  %v848_v45 = vadd.f32 %v832_v6, %v752_v36 }
 0x5b6   :  { %1835 = vtanh.f32 %v842_v7 }
 0x5b7   :  { %1837 = vtanh.f32 %v843_v8 }
 0x5b8   :  { %1839 = vtanh.f32 %v844_v24 }
 0x5b9   :  { %1841 = vtanh.f32 %v845_v44 }
 0x5ba   :  { %1843 = vtanh.f32 %v846_v43 }
 0x5bb   :  { %1845 = vtanh.f32 %v847_v46 }
 0x5bc   :  { %1847 = vtanh.f32 %v848_v45 }
 0x5bf   :  { %v1834_v57 = vpop.eup %1833 }
 0x5c0   :  { %v1836_v21 = vpop.eup %1835  ;;  %v857_v47 = vpack.c.bf16 %v1834_v57, %v1834_v57 }
 0x5c1   :  { %v1838_v48 = vpop.eup %1837  ;;  %v858_v49 = vpack.c.bf16 %v1836_v21, %v1836_v21 }
 0x5c2   :  { %v1840_v50 = vpop.eup %1839  ;;  %v859_v53 = vpack.c.bf16 %v1838_v48, %v1838_v48  ;;  %v1233_v54 = vshll.u32 %v857_v47, 16  ;;  %v894_v11 = vunpack.c.l.b16 %v857_v47 }
 0x5c3   :  { %v1842_v55 = vpop.eup %1841  ;;  %v1237_v40 = vshll.u32 %v858_v49, 16  ;;  %v860_v56 = vpack.c.bf16 %v1840_v50, %v1840_v50  ;;  %v895_v58 = vunpack.c.l.b16 %v858_v49 }
 0x5c4   :  { %v1844_v60 = vpop.eup %1843  ;;  %v2529_v62 = vrot.slane %v1233_v54, 6  ;;  %v1241_v9 = vshll.u32 %v859_v53, 16  ;;  %v861_v12 = vpack.c.bf16 %v1842_v55, %v1842_v55  ;;  %v896_v15 = vunpack.c.l.b16 %v859_v53  ;;  %v878_v55 = vld [vmem:[%s2767_s0 + $0x6] sm:$0x1] }
 0x5c5   :  { %v1846_v63 = vpop.eup %1845  ;;  %v2531_v22 = vrot.slane %v1237_v40, 6  ;;  %v862_v23 = vpack.c.bf16 %v1844_v60, %v1844_v60  ;;  %v897_v10 = vunpack.c.l.b16 %v860_v56  ;;  %v902_v17 = vrot.slane %v895_v58, 7  ;;  %v880_v40 = vld [vmem:[%s2767_s0 + $0x16] sm:$0x1]  ;;  %v882_v58 = vld [vmem:[%s2767_s0 + $0x26] sm:$0x1] }
 0x5c6   :  { %v1848_v32 = vpop.eup %1847  ;;  %v2533_v28 = vrot.slane %v1241_v9, 6  ;;  %v1411_v29 = vsel %vm2525_vm0, %v2402_v5, %v2529_v62  ;;  %v863_v31 = vpack.c.bf16 %v1846_v63, %v1846_v63  ;;  %v898_v33 = vunpack.c.l.b16 %v861_v12 }
 0x5c7   :  { %v1412_v34 = vsel %vm2525_vm0, %v2410_v39, %v2531_v22  ;;  %v864_v59 = vpack.c.bf16 %v1848_v32, %v1848_v32  ;;  %v899_v13 = vunpack.c.l.b16 %v862_v23  ;;  %v903_v0 = vsel %vm231_vm1, %v902_v17, %v894_v11  ;;  %v879_v11 = vld [vmem:[%s2767_s0 + $0xe] sm:$0x1] }
 0x5c8   :  { %v1413_v19 = vsel %vm2525_vm0, %v2418_v52, %v2533_v28  ;;  %v900_v20 = vunpack.c.l.b16 %v863_v31  ;;  %v904_v25 = vrot.slane %v896_v15, 6  ;;  %v906_v27 = vrot.slane %v897_v10, 5  ;;  %v883_v10 = vld [vmem:[%s2767_s0 + $0x2e] sm:$0x1] }
 0x5c9   :  { %v901_v26 = vunpack.c.l.b16 %v864_v59  ;;  %v908_v30 = vrot.slane %v898_v33, 4  ;;  %v1245_v35 = vshll.u32 %v860_v56, 16  ;;  %v910_v1 = vrot.slane %v899_v13, 3  ;;  %v881_v56 = vld [vmem:[%s2767_s0 + $0x1e] sm:$0x1] }
 0x5ca   :  { %v905_v61 = vsel %vm234_vm2, %v904_v25, %v903_v0  ;;  %v1249_v2 = vshll.u32 %v861_v12, 16  ;;  %v1253_v3 = vshll.u32 %v862_v23, 16  ;;  %v912_v6 = vrot.slane %v900_v20, 2 }
 0x5cb   :  { %v907_v4 = vsel %vm237_vm3, %v906_v27, %v905_v61  ;;  %v2550_v7 = vrot.slane %v1245_v35, 6  ;;  %v1257_v8 = vshll.u32 %v863_v31, 16  ;;  %v1261_v44 = vshll.u32 %v864_v59, 16 }
 0x5cc   :  { %v909_v24 = vsel %vm240_vm4, %v908_v30, %v907_v4  ;;  %v2553_v41 = vrot.slane %v1249_v2, 6  ;;  %v2555_v42 = vrot.slane %v1253_v3, 6  ;;  %v914_v43 = vrot.slane %v901_v26, 1  ;;  %v884_v26 = vld [vmem:[%s2767_s0 + $0x36] sm:$0x1] }
 0x5cd   :  { %v911_v36 = vsel %vm243_vm5, %v910_v1, %v909_v24  ;;  %v2558_v46 = vrot.slane %v1257_v8, 6  ;;  %v1414_v45 = vsel %vm2525_vm0, %v2431_v14, %v2550_v7  ;;  %v2565_v21 = vrot.slane %v1261_v44, 6  ;;  %v885_v30 = vld [vmem:[%s2767_s0 + $0x3e] sm:$0x1] }
 0x5ce   :  { %v913_v57 = vsel %vm246_vm6, %v912_v6, %v911_v36  ;;  %v1415_v47 = vsel %vm2525_vm0, %v2440_v16, %v2553_v41  ;;  %v1416_v48 = vsel %vm2525_vm0, %v2448_v37, %v2555_v42  ;;  %v1011_v42 = vld [vmem:[%s2767_s0 + $0x7] sm:$0x1] }
 0x5cf   :  { %v915_v49 = vsel %vm249_vm7, %v914_v43, %v913_v57  ;;  %v1417_v50 = vsel %vm2525_vm0, %v2456_v18, %v2558_v46  ;;  %v1418_v54 = vsel %vm2525_vm0, %v2465_v38, %v2565_v21  ;;  %v1012_v18 = vld [vmem:[%s2767_s0 + $0xf] sm:$0x1]  ;;  %v1014_v38 = vld [vmem:[%s2767_s0 + $0x1f] sm:$0x1]  ;;  %v1015_v46 = vld [vmem:[%s2767_s0 + $0x27] sm:$0x1] }
 0x5d0   :  { %v916_v53 = vpack.c.b16 %v915_v49, %v915_v49 }
 0x5d2   :  { %1720 = vmatmul.mubr.bf16.vlgmr.msra.gmra.mrb[12].mxu0 %v916_v53 }
 0x6a5   :  { %v952_v60 = vpop.f32.mrb[12].mxu0 }
 0x6a6   :  { %v959_v9 = vrot.slane %v952_v60, 1  ;;  %v960_v12 = vrot.slane %v952_v60, 2  ;;  %v961_v15 = vrot.slane %v952_v60, 3  ;;  %v962_v63 = vrot.slane %v952_v60, 4  ;;  %v1721_v23 = vpop.f32.mrb[13].mxu0 }
 0x6a7   :  { %v963_v17 = vrot.slane %v952_v60, 5  ;;  %v964_v32 = vrot.slane %v952_v60, 6  ;;  %v974_v31 = vadd.f32 %v952_v60, %v878_v55  ;;  %v955_v33 = vpop.f32.mrb[14].mxu0  ;;  %v965_v59 = vrot.slane %v952_v60, 7 }
 0x6a8   :  { %v975_v13 = vadd.f32 %v959_v9, %v879_v11  ;;  %v976_v0 = vadd.f32 %v960_v12, %v880_v40  ;;  %v977_v20 = vadd.f32 %v961_v15, %v881_v56  ;;  %v1722_v25 = vpop.f32.mrb[15].mxu0  ;;  %v978_v27 = vadd.f32 %v962_v63, %v882_v58 }
 0x6a9   :  { %1849 = vtanh.f32 %v974_v31  ;;  %v979_v35 = vadd.f32 %v963_v17, %v883_v10  ;;  %v980_v61 = vadd.f32 %v964_v32, %v884_v26  ;;  %v981_v1 = vadd.f32 %v965_v59, %v885_v30 }
 0x6aa   :  { %1851 = vtanh.f32 %v975_v13 }
 0x6ab   :  { %1853 = vtanh.f32 %v976_v0 }
 0x6ac   :  { %1855 = vtanh.f32 %v977_v20 }
 0x6ad   :  { %1857 = vtanh.f32 %v978_v27 }
 0x6ae   :  { %1859 = vtanh.f32 %v979_v35 }
 0x6af   :  { %1861 = vtanh.f32 %v980_v61 }
 0x6b0   :  { %1863 = vtanh.f32 %v981_v1 }
 0x6b3   :  { %v1850_v2 = vpop.eup %1849 }
 0x6b4   :  { %v1852_v3 = vpop.eup %1851  ;;  %v990_v4 = vpack.c.bf16 %v1850_v2, %v1850_v2 }
 0x6b5   :  { %v1854_v6 = vpop.eup %1853  ;;  %v991_v8 = vpack.c.bf16 %v1852_v3, %v1852_v3 }
 0x6b6   :  { %v1856_v24 = vpop.eup %1855  ;;  %v992_v44 = vpack.c.bf16 %v1854_v6, %v1854_v6  ;;  %v1272_v36 = vrot.slane %v990_v4, 5  ;;  %v1027_v57 = vunpack.c.l.b16 %v990_v4  ;;  %v1016_v4 = vld [vmem:[%s2767_s0 + $0x2f] sm:$0x1] }
 0x6b7   :  { %v1858_v43 = vpop.eup %1857  ;;  %v1273_v49 = vrot.slane %v991_v8, 5  ;;  %v993_v53 = vpack.c.bf16 %v1856_v24, %v1856_v24  ;;  %v1028_v55 = vunpack.c.l.b16 %v991_v8 }
 0x6b8   :  { %v1860_v11 = vpop.eup %1859  ;;  %v1274_v40 = vrot.slane %v992_v44, 5  ;;  %v2614_v56 = vsel %vm1408_vm14, %v1411_v29, %v1272_v36  ;;  %v994_v58 = vpack.c.bf16 %v1858_v43, %v1858_v43  ;;  %v1029_v60 = vunpack.c.l.b16 %v992_v44  ;;  %v1017_v36 = vld [vmem:[%s2767_s0 + $0x37] sm:$0x1] }
 0x6b9   :  { %v1862_v9 = vpop.eup %1861  ;;  %v2622_v12 = vsel %vm1408_vm14, %v1412_v34, %v1273_v49  ;;  %v995_v15 = vpack.c.bf16 %v1860_v11, %v1860_v11  ;;  %v1030_v63 = vunpack.c.l.b16 %v993_v53  ;;  %v1035_v23 = vrot.slane %v1028_v55, 7  ;;  %v1018_v11 = vld [vmem:[%s2767_s0 + $0x3f] sm:$0x1] }
 0x6ba   :  { %v1864_v10 = vpop.eup %1863  ;;  %v2630_v5 = vsel %vm1408_vm14, %v1413_v19, %v1274_v40  ;;  %v996_v62 = vpack.c.bf16 %v1862_v9, %v1862_v9  ;;  %v1031_v29 = vunpack.c.l.b16 %v994_v58  ;;  %v1037_v17 = vrot.slane %v1029_v60, 6 }
 0x6bb   :  { %v997_v32 = vpack.c.bf16 %v1864_v10, %v1864_v10  ;;  %v1032_v39 = vunpack.c.l.b16 %v995_v15  ;;  %v1036_v22 = vsel %vm231_vm1, %v1035_v23, %v1027_v57  ;;  %v1039_v34 = vrot.slane %v1030_v63, 5 }
 0x6bc   :  { %v1033_v31 = vunpack.c.l.b16 %v996_v62  ;;  %v1038_v33 = vsel %vm234_vm2, %v1037_v17, %v1036_v22  ;;  %v1041_v59 = vrot.slane %v1031_v29, 4  ;;  %v1275_v13 = vrot.slane %v993_v53, 5 }
 0x6bd   :  { %v1034_v0 = vunpack.c.l.b16 %v997_v32  ;;  %v1040_v20 = vsel %vm237_vm3, %v1039_v34, %v1038_v33  ;;  %v1043_v52 = vrot.slane %v1032_v39, 3  ;;  %v1276_v28 = vrot.slane %v994_v58, 5 }
 0x6be   :  { %v1042_v19 = vsel %vm240_vm4, %v1041_v59, %v1040_v20  ;;  %v1045_v25 = vrot.slane %v1033_v31, 2  ;;  %v1277_v26 = vrot.slane %v995_v15, 5  ;;  %v1278_v27 = vrot.slane %v996_v62, 5 }
 0x6bf   :  { %v1044_v30 = vsel %vm243_vm5, %v1043_v52, %v1042_v19  ;;  %v1047_v35 = vrot.slane %v1034_v0, 1  ;;  %v1279_v61 = vrot.slane %v997_v32, 5  ;;  %v2643_v1 = vsel %vm1408_vm14, %v1414_v45, %v1275_v13 }
 0x6c0   :  { %v1046_v2 = vsel %vm246_vm6, %v1045_v25, %v1044_v30  ;;  %v2652_v3 = vsel %vm1408_vm14, %v1415_v47, %v1276_v28  ;;  %v2660_v14 = vsel %vm1408_vm14, %v1416_v48, %v1277_v26  ;;  %v2668_v7 = vsel %vm1408_vm14, %v1417_v50, %v1278_v27 }
 0x6c1   :  { %v1048_v16 = vsel %vm249_vm7, %v1047_v35, %v1046_v2  ;;  %v2677_v37 = vsel %vm1408_vm14, %v1418_v54, %v1279_v61 }
 0x6c2   :  { %v1049_v41 = vpack.c.b16 %v1048_v16, %v1048_v16 }
 0x6c4   :  { %1740 = vmatmul.mubr.bf16.vlgmr.msra.gmra.mrb[12].mxu1 %v1049_v41 }
 0x797   :  { %v1085_v45 = vpop.f32.mrb[12].mxu1 }
 0x798   :  { %v1092_v21 = vrot.slane %v1085_v45, 1  ;;  %v1093_v47 = vrot.slane %v1085_v45, 2  ;;  %v1094_v48 = vrot.slane %v1085_v45, 3  ;;  %v1095_v50 = vrot.slane %v1085_v45, 4  ;;  %v1741_v54 = vpop.f32.mrb[13].mxu1 }
 0x799   :  { %v1096_v6 = vrot.slane %v1085_v45, 5  ;;  %v1097_v8 = vrot.slane %v1085_v45, 6  ;;  %v1107_v24 = vadd.f32 %v1085_v45, %v1011_v42  ;;  %v1088_v44 = vpop.f32.mrb[14].mxu1  ;;  %v1098_v43 = vrot.slane %v1085_v45, 7 }
 0x79a   :  { %v1108_v57 = vadd.f32 %v1092_v21, %v1012_v18  ;;  %v1109_v49 = vadd.f32 %v1093_v47, %v1013_v51  ;;  %v1110_v53 = vadd.f32 %v1094_v48, %v1014_v38  ;;  %v1742_v55 = vpop.f32.mrb[15].mxu1  ;;  %v1111_v40 = vadd.f32 %v1095_v50, %v1015_v46 }
 0x79b   :  { %1865 = vtanh.f32 %v1107_v24  ;;  %v1112_v58 = vadd.f32 %v1096_v6, %v1016_v4  ;;  %v1113_v60 = vadd.f32 %v1097_v8, %v1017_v36  ;;  %v1114_v9 = vadd.f32 %v1098_v43, %v1018_v11 }
 0x79c   :  { %1867 = vtanh.f32 %v1108_v57 }
 0x79d   :  { %1869 = vtanh.f32 %v1109_v49 }
 0x79e   :  { %1871 = vtanh.f32 %v1110_v53 }
 0x79f   :  { %1873 = vtanh.f32 %v1111_v40 }
 0x7a0   :  { %1875 = vtanh.f32 %v1112_v58 }
 0x7a1   :  { %1877 = vtanh.f32 %v1113_v60 }
 0x7a2   :  { %1879 = vtanh.f32 %v1114_v9 }
 0x7a5   :  { %v1866_v15 = vpop.eup %1865 }
 0x7a6   :  { %v1868_v63 = vpop.eup %1867  ;;  %v1123_v23 = vpack.c.bf16 %v1866_v15, %v1866_v15 }
 0x7a7   :  { %v1870_v10 = vpop.eup %1869  ;;  %v1124_v62 = vpack.c.bf16 %v1868_v63, %v1868_v63  ;;  %v1479_v29 = vrot.slane %v1868_v63, 7 }
 0x7a8   :  { %v1872_v17 = vpop.eup %1871  ;;  %v1125_v32 = vpack.c.bf16 %v1870_v10, %v1870_v10  ;;  %v1281_v39 = vshll.u32 %v1123_v23, 16  ;;  %v1481_v22 = vrot.slane %v1870_v10, 6 }
 0x7a9   :  { %v1874_v34 = vpop.eup %1873  ;;  %v1126_v31 = vpack.c.bf16 %v1872_v17, %v1872_v17  ;;  %v1285_v33 = vshll.u32 %v1124_v62, 16  ;;  %v1480_v13 = vsel %vm231_vm1, %v1479_v29, %v1866_v15  ;;  %v1483_v0 = vrot.slane %v1872_v17, 5 }
 0x7aa   :  { %v1876_v20 = vpop.eup %1875  ;;  %v1127_v52 = vpack.c.bf16 %v1874_v34, %v1874_v34  ;;  %v1283_v28 = vrot.slane %v1281_v39, 5  ;;  %v1289_v19 = vshll.u32 %v1125_v32, 16  ;;  %v1482_v25 = vsel %vm234_vm2, %v1481_v22, %v1480_v13 }
 0x7ab   :  { %v1878_v26 = vpop.eup %1877  ;;  %v1128_v27 = vpack.c.bf16 %v1876_v20, %v1876_v20  ;;  %v1287_v30 = vrot.slane %v1285_v33, 5  ;;  %v1293_v35 = vshll.u32 %v1126_v31, 16  ;;  %v1484_v61 = vsel %vm237_vm3, %v1483_v0, %v1482_v25 }
 0x7ac   :  { %v1880_v2 = vpop.eup %1879  ;;  %v1129_v16 = vpack.c.bf16 %v1878_v26, %v1878_v26  ;;  %v1291_v41 = vrot.slane %v1289_v19, 5  ;;  %v1297_v42 = vshll.u32 %v1127_v52, 16  ;;  %v1455_v18 = vsel %vm2703_vm10, %v2614_v56, %v1283_v28 }
 0x7ad   :  { %v1130_v51 = vpack.c.bf16 %v1880_v2, %v1880_v2  ;;  %v1295_v38 = vrot.slane %v1293_v35, 5  ;;  %v1301_v46 = vshll.u32 %v1128_v27, 16  ;;  %v1456_v45 = vsel %vm2703_vm10, %v2622_v12, %v1287_v30  ;;  %1463 = vst [vmem:[%s2768_s3] sm:$0xf] %v1455_v18 }
 0x7ae   :  { %v1299_v21 = vrot.slane %v1297_v42, 5  ;;  %v1305_v47 = vshll.u32 %v1129_v16, 16  ;;  %v1457_v48 = vsel %vm2703_vm10, %v2630_v5, %v1291_v41  ;;  %1464 = vst [vmem:[%s2768_s3 + $0x4] sm:$0xf] %v1456_v45  ;;  %v1485_v56 = vrot.slane %v1874_v34, 4 }
 0x7af   :  { %v1303_v50 = vrot.slane %v1301_v46, 5  ;;  %v1309_v54 = vshll.u32 %v1130_v51, 16  ;;  %v1458_v12 = vsel %vm2703_vm10, %v2643_v1, %v1295_v38  ;;  %1465 = vst [vmem:[%s2768_s3 + $0x8] sm:$0xf] %v1457_v48  ;;  %v1487_v4 = vrot.slane %v1876_v20, 3 }
 0x7b0   :  { %v1307_v6 = vrot.slane %v1305_v47, 5  ;;  %v1459_v5 = vsel %vm2703_vm10, %v2652_v3, %v1299_v21  ;;  %1466 = vst [vmem:[%s2768_s3 + $0xc] sm:$0xf] %v1458_v12  ;;  %v1486_v8 = vsel %vm240_vm4, %v1485_v56, %v1484_v61  ;;  %v1489_v24 = vrot.slane %v1878_v26, 2 }
 0x7b1   :  { %v1311_v44 = vrot.slane %v1309_v54, 5  ;;  %v1460_v1 = vsel %vm2703_vm10, %v2660_v14, %v1303_v50  ;;  %1467 = vst [vmem:[%s2768_s3 + $0x10] sm:$0xf] %v1459_v5  ;;  %v1488_v36 = vsel %vm243_vm5, %v1487_v4, %v1486_v8  ;;  %v1491_v43 = vrot.slane %v1880_v2, 1 }
 0x7b2   :  { %v1461_v3 = vsel %vm2703_vm10, %v2668_v7, %v1307_v6  ;;  %1468 = vst [vmem:[%s2768_s3 + $0x14] sm:$0xf] %v1460_v1  ;;  %v1490_v57 = vsel %vm246_vm6, %v1489_v24, %v1488_v36 }
 0x7b3   :  { %v1462_v14 = vsel %vm2703_vm10, %v2677_v37, %v1311_v44  ;;  %1469 = vst [vmem:[%s2768_s3 + $0x18] sm:$0xf] %v1461_v3  ;;  %v1492_v49 = vsel %vm249_vm7, %v1491_v43, %v1490_v57 }
 0x7b4   :  { %1470 = vst [vmem:[%s2768_s3 + $0x1c] sm:$0xf] %v1462_v14  ;;  %1494 = vst [vmem:[%s2769_s4] sm:$0xff] %v1492_v49 }

</bundles_post_ra>
